<compile_context>
chip_gen: v5e
topology: v5e:2x2
jax: 0.10.0
libtpu: 0.0.40
codegen_flags: <defaults>
</compile_context>

<pallas_src>
import functools

import jax
import jax.numpy as jnp
from jax.experimental import pallas as pl
from jax.experimental.pallas import tpu as pltpu

EPS = 1e-5
NEG_SLOPE = 0.1


# ----------------------------------------------------------------------------
# Generation-aware configuration helpers
# ----------------------------------------------------------------------------
def _tpu_vmem_capacity_bytes():
    try:
        info = pltpu.get_tpu_info()
        cap = int(getattr(info, "vmem_capacity_bytes", 0) or 0)
        if cap > 0:
            return cap
    except Exception:
        pass
    return 128 * 1024 * 1024  # v5e / v6e default


def _vmem_limit_bytes():
    cap = _tpu_vmem_capacity_bytes()
    if cap <= 80 * 1024 * 1024:       # v7x-class: 64 MiB per TensorCore
        return 40 * 1024 * 1024        # leave headroom for scratch / spills
    return 96 * 1024 * 1024            # v5e / v6e: 128 MiB physical


def _pick_row_tile(rows, row_bytes, vmem_limit):
    """Largest multiple-of-8 divisor of `rows` (<= ~4096) whose double-buffered
    footprint stays well under the VMEM limit."""
    target = max(256, min(4096, (vmem_limit // 4) // max(row_bytes, 1)))
    if rows <= target:
        return rows
    t = min(rows, target)
    t -= t % 8
    for cand in range(t, 7, -8):
        if rows % cand == 0:
            return cand
    # TODO(synk): rows with no multiple-of-8 divisor fall back to one block.
    return rows


def _pick_h_tile(hgt, h_row_bytes, vmem_limit):
    cap = max(1, (vmem_limit // 3) // max(h_row_bytes, 1))
    cap = min(cap, hgt, 64)
    for cand in range(cap, 0, -1):
        if hgt % cand == 0:
            return cand
    return 1


def _pick_cout_tile(cout, cmid, dtype_bytes, vmem_limit):
    """Tile Cout of the 3x3 weight so the double-buffered weight block stays
    small.  Tiles must be multiples of 128 (lane-dense / (8,128) rule)."""
    if cout % 128 != 0:
        return cout
    budget = vmem_limit // 8
    per_co = 9 * cmid * dtype_bytes * 2          # 2 buffers per Cout column
    max_co = max(128, (budget // max(per_co, 1)) // 128 * 128)
    if max_co >= cout:
        return cout
    for cand in range(max_co, 127, -128):
        if cout % cand == 0:
            return cand
    return cout


# ----------------------------------------------------------------------------
# BN partial statistics: per-tile [sum, sum((x - tile_mean)^2)] (mean-shifted)
# ----------------------------------------------------------------------------
def _partial_stats(acc):
    rows = acc.shape[0]
    s = jnp.sum(acc, axis=0, keepdims=True)
    m2 = jnp.sum((acc - s * (1.0 / rows)) ** 2, axis=0, keepdims=True)
    return jnp.concatenate([s, m2], axis=0)          # one (2, C) store


def _bn_scale_shift(partials, gamma, beta, count):
    """Combine per-tile mean-shifted partials (Chan's parallel variance)."""
    c = partials.shape[-1]
    p = partials.reshape(-1, 2, c)
    ntiles = p.shape[0]
    rows_per_tile = count // ntiles
    sums = p[:, 0, :]
    m2s = p[:, 1, :]
    tile_mean = sums / rows_per_tile
    mean = jnp.sum(sums, axis=0) / count
    var = (jnp.sum(m2s, axis=0)
           + rows_per_tile * jnp.sum((tile_mean - mean) ** 2, axis=0)) / count
    var = jnp.maximum(var, 0.0)
    scale = gamma.astype(jnp.float32) * jax.lax.rsqrt(var + EPS)
    shift = beta.astype(jnp.float32) - mean * scale
    return scale.reshape(1, c), shift.reshape(1, c)


# ----------------------------------------------------------------------------
# Kernel A0 (first repeat): 1x1 conv over row tiles + fused BN partial stats
# ----------------------------------------------------------------------------
def _conv1x1_stats_kernel(x_ref, w_ref, y_ref, part_ref):
    acc = jnp.dot(x_ref[...], w_ref[...], preferred_element_type=jnp.float32)
    y_ref[...] = acc.astype(y_ref.dtype)
    part_ref[...] = _partial_stats(acc)


def conv1x1_stats(x2d, w1, *, row_tile, vmem_limit):
    r, cin = x2d.shape
    cmid = w1.shape[1]
    nt = r // row_tile
    return pl.pallas_call(
        _conv1x1_stats_kernel,
        grid=(nt,),
        in_specs=[
            pl.BlockSpec((row_tile, cin), lambda i: (i, 0)),
            pl.BlockSpec((cin, cmid), lambda i: (0, 0)),
        ],
        out_specs=(
            pl.BlockSpec((row_tile, cmid), lambda i: (i, 0)),
            pl.BlockSpec((None, 2, cmid), lambda i: (i, 0, 0)),
        ),
        out_shape=(
            jax.ShapeDtypeStruct((r, cmid), x2d.dtype),
            jax.ShapeDtypeStruct((nt, 2, cmid), jnp.float32),
        ),
        compiler_params=pltpu.CompilerParams(
            dimension_semantics=("parallel",),
            vmem_limit_bytes=vmem_limit,
        ),
    )(x2d, w1)


# ----------------------------------------------------------------------------
# Kernel A (repeats > 0): fused BN2 + LeakyReLU (+ residual) -> 1x1 conv
#   x_new = act(BN(y2_prev)) [+ x_old]   (written out only if residual is used)
#   y1    = x_new @ w1                   (+ BN partial stats of y1)
# ----------------------------------------------------------------------------
def _fused_update_conv1x1_kernel(use_residual, *refs):
    if use_residual:
        (y2_ref, scale_ref, shift_ref, xold_ref, w_ref,
         xnew_ref, y1_ref, part_ref) = refs
    else:
        (y2_ref, scale_ref, shift_ref, w_ref, y1_ref, part_ref) = refs
    v = y2_ref[...].astype(jnp.float32) * scale_ref[...] + shift_ref[...]
    v = jnp.where(v > 0, v, NEG_SLOPE * v)
    if use_residual:
        v = v + xold_ref[...].astype(jnp.float32)
    xnew = v.astype(y1_ref.dtype)
    if use_residual:
        xnew_ref[...] = xnew
    acc = jnp.dot(xnew, w_ref[...], preferred_element_type=jnp.float32)
    y1_ref[...] = acc.astype(y1_ref.dtype)
    part_ref[...] = _partial_stats(acc)


def fused_update_conv1x1(y2d, scale, shift, xold2d, w1, *, row_tile,
                         use_residual, vmem_limit):
    r, c = y2d.shape
    cmid = w1.shape[1]
    nt = r // row_tile

    in_specs = [
        pl.BlockSpec((row_tile, c), lambda i: (i, 0)),
        pl.BlockSpec((1, c), lambda i: (0, 0)),
        pl.BlockSpec((1, c), lambda i: (0, 0)),
    ]
    args = [y2d, scale, shift]
    if use_residual:
        in_specs.append(pl.BlockSpec((row_tile, c), lambda i: (i, 0)))
        args.append(xold2d)
    in_specs.append(pl.BlockSpec((c, cmid), lambda i: (0, 0)))
    args.append(w1)

    out_specs = [pl.BlockSpec((row_tile, cmid), lambda i: (i, 0)),
                 pl.BlockSpec((None, 2, cmid), lambda i: (i, 0, 0))]
    out_shape = [jax.ShapeDtypeStruct((r, cmid), y2d.dtype),
                 jax.ShapeDtypeStruct((nt, 2, cmid), jnp.float32)]
    if use_residual:
        out_specs.insert(0, pl.BlockSpec((row_tile, c), lambda i: (i, 0)))
        out_shape.insert(0, jax.ShapeDtypeStruct((r, c), y2d.dtype))

    return pl.pallas_call(
        functools.partial(_fused_update_conv1x1_kernel, use_residual),
        grid=(nt,),
        in_specs=in_specs,
        out_specs=tuple(out_specs),
        out_shape=tuple(out_shape),
        compiler_params=pltpu.CompilerParams(
            dimension_semantics=("parallel",),
            vmem_limit_bytes=vmem_limit,
        ),
    )(*args)


# ----------------------------------------------------------------------------
# Kernel B: fused BN1 + LeakyReLU -> 3x3 conv (pad=1) as ONE im2col matmul
#           + fused BN partial stats of the conv output.
#   H-halo via two extra one-row BlockSpec views (no HBM padding).
#   Padded tile + im2col patches live in VMEM scratch, built once per (n, h)
#   tile (pl.when(co == 0)) and reused across Cout blocks (innermost,
#   'arbitrary' axis -> sequential per core, so the reuse is safe).
# ----------------------------------------------------------------------------
def _conv3x3_stats_kernel(y1m_ref, y1t_ref, y1b_ref, w_ref, scale_ref, shift_ref,
                          y2_ref, part_ref, pad_ref, col_ref):
    th, width, cmid = y1m_ref.shape
    coutt = y2_ref.shape[-1]
    hb = pl.program_id(1)
    nhb = pl.num_programs(1)
    co = pl.program_id(2)

    @pl.when(co == 0)
    def _():
        def bn_act(v):  # BN (precomputed scale/shift) + LeakyReLU, math in f32
            v = v.astype(jnp.float32) * scale_ref[...] + shift_ref[...]
            return jnp.where(v > 0, v, NEG_SLOPE * v).astype(pad_ref.dtype)

        zcol = jnp.zeros((th + 2, 1, cmid), pad_ref.dtype)
        pad_ref[:, 0:1, :] = zcol                       # left zero-pad column
        pad_ref[:, width + 1:width + 2, :] = zcol       # right zero-pad column
        pad_ref[1:th + 1, 1:width + 1, :] = bn_act(y1m_ref[...])
        top = bn_act(y1t_ref[...])
        bot = bn_act(y1b_ref[...])
        pad_ref[0:1, 1:width + 1, :] = jnp.where(hb > 0, top,
                                                 jnp.zeros_like(top))
        pad_ref[th + 1:th + 2, 1:width + 1, :] = jnp.where(
            hb < nhb - 1, bot, jnp.zeros_like(bot))

        # im2col patch slab: (TH, W, 9*Cmid), channel-fastest per (dy, dx).
        for dy in range(3):
            for dx in range(3):
                k = dy * 3 + dx
                col_ref[:, :, k * cmid:(k + 1) * cmid] = (
                    pad_ref[dy:dy + th, dx:dx + width, :])

    patches = col_ref[...].reshape(th * width, 9 * cmid)
    acc = jnp.dot(patches, w_ref[...], preferred_element_type=jnp.float32)
    y2_ref[...] = acc.reshape(th, width, coutt).astype(y2_ref.dtype)
    part_ref[...] = _partial_stats(acc)


def conv3x3_stats(y1_4d, w2_flat, scale1, shift1, *, h_tile, cout_tile,
                  act_dtype, vmem_limit):
    n, hgt, width, cmid = y1_4d.shape
    cout = w2_flat.shape[-1]
    nhb = hgt // h_tile
    nco = cout // cout_tile

    main_blk = lambda nb, hb, co: (nb, hb, 0, 0)
    top_row = lambda nb, hb, co: (nb, jnp.maximum(hb * h_tile - 1, 0), 0, 0)
    bot_row = lambda nb, hb, co: (nb, jnp.minimum((hb + 1) * h_tile, hgt - 1),
                                  0, 0)

    return pl.pallas_call(
        _conv3x3_stats_kernel,
        grid=(n, nhb, nco),
        in_specs=[
            pl.BlockSpec((None, h_tile, width, cmid), main_blk),
            pl.BlockSpec((None, 1, width, cmid), top_row),    # halo row above
            pl.BlockSpec((None, 1, width, cmid), bot_row),    # halo row below
            pl.BlockSpec((9 * cmid, cout_tile), lambda nb, hb, co: (0, co)),
            pl.BlockSpec((1, cmid), lambda nb, hb, co: (0, 0)),
            pl.BlockSpec((1, cmid), lambda nb, hb, co: (0, 0)),
        ],
        out_specs=(
            pl.BlockSpec((None, h_tile, width, cout_tile),
                         lambda nb, hb, co: (nb, hb, 0, co)),
            pl.BlockSpec((None, None, 2, cout_tile),
                         lambda nb, hb, co: (nb, hb, 0, co)),
        ),
        out_shape=(
            jax.ShapeDtypeStruct((n, hgt, width, cout), act_dtype),
            jax.ShapeDtypeStruct((n, nhb, 2, cout), jnp.float32),
        ),
        scratch_shapes=[
            pltpu.VMEM((h_tile + 2, width + 2, cmid), act_dtype),   # padded tile
            pltpu.VMEM((h_tile, width, 9 * cmid), act_dtype),       # im2col slab
        ],
        compiler_params=pltpu.CompilerParams(
            dimension_semantics=("parallel", "parallel", "arbitrary"),
            vmem_limit_bytes=vmem_limit,
        ),
    )(y1_4d, y1_4d, y1_4d, w2_flat, scale1, shift1)


# ----------------------------------------------------------------------------
# Kernel C (final repeat only): pointwise BN + LeakyReLU (+ optional residual)
# ----------------------------------------------------------------------------
def _bn_act_kernel(y_ref, scale_ref, shift_ref, o_ref):
    v = y_ref[...].astype(jnp.float32) * scale_ref[...] + shift_ref[...]
    o_ref[...] = jnp.where(v > 0, v, NEG_SLOPE * v).astype(o_ref.dtype)


def _bn_act_res_kernel(y_ref, scale_ref, shift_ref, res_ref, o_ref):
    v = y_ref[...].astype(jnp.float32) * scale_ref[...] + shift_ref[...]
    v = jnp.where(v > 0, v, NEG_SLOPE * v) + res_ref[...].astype(jnp.float32)
    o_ref[...] = v.astype(o_ref.dtype)


def bn_act_residual(y2d, scale, shift, residual2d, *, row_tile, vmem_limit):
    r, c = y2d.shape
    nt = r // row_tile
    in_specs = [
        pl.BlockSpec((row_tile, c), lambda i: (i, 0)),
        pl.BlockSpec((1, c), lambda i: (0, 0)),
        pl.BlockSpec((1, c), lambda i: (0, 0)),
    ]
    args = [y2d, scale, shift]
    if residual2d is not None:
        in_specs.append(pl.BlockSpec((row_tile, c), lambda i: (i, 0)))
        args.append(residual2d)
        kernel = _bn_act_res_kernel
    else:
        kernel = _bn_act_kernel
    return pl.pallas_call(
        kernel,
        grid=(nt,),
        in_specs=in_specs,
        out_specs=pl.BlockSpec((row_tile, c), lambda i: (i, 0)),
        out_shape=jax.ShapeDtypeStruct((r, c), y2d.dtype),
        compiler_params=pltpu.CompilerParams(
            dimension_semantics=("parallel",),
            vmem_limit_bytes=vmem_limit,
        ),
    )(*args)


# ----------------------------------------------------------------------------
# ResidualBlock forward (NCHW in / NCHW out, like PyTorch)
# ----------------------------------------------------------------------------
def residual_block_forward(x_nchw, params, use_residual=True,
                           act_dtype=jnp.float32, row_tile=None, h_tile=None,
                           cout_tile=None):
    if not params:
        return x_nchw
    n, c, hgt, wdt = x_nchw.shape
    cmid = c // 2
    r = n * hgt * wdt
    dtype_bytes = jnp.dtype(act_dtype).itemsize
    vmem_limit = _vmem_limit_bytes()

    if cout_tile is None:
        cout_tile = _pick_cout_tile(c, cmid, dtype_bytes, vmem_limit)
    if row_tile is None:
        row_bytes = (3 * c + cmid) * dtype_bytes * 2     # fused kernel A streams
        row_tile = _pick_row_tile(r, row_bytes, vmem_limit)
    if h_tile is None:
        h_row_bytes = (wdt * (cmid + cout_tile) * 2
                       + (wdt + 2) * cmid + wdt * 9 * cmid) * dtype_bytes
        h_tile = _pick_h_tile(hgt, h_row_bytes, vmem_limit)

    assert r % row_tile == 0 and (row_tile == r or row_tile % 8 == 0)
    assert hgt % h_tile == 0 and c % cout_tile == 0

    # NCHW -> NHWC -> lane-dense 2D slab (rows, C)
    x2d = jnp.transpose(x_nchw, (0, 2, 3, 1)).reshape(r, c).astype(act_dtype)

    prev_y2 = prev_scale = prev_shift = None
    for idx, (w1, g1, b1, w2, g2, b2) in enumerate(params):
        w1 = w1.astype(act_dtype)
        w2f = w2.reshape(9 * cmid, c).astype(act_dtype)   # (9*Cmid, Cout)

        # Stage 1: 1x1 conv (+ fused update of x from the previous repeat).
        if idx == 0:
            y1, p1 = conv1x1_stats(x2d, w1, row_tile=row_tile,
                                   vmem_limit=vmem_limit)
        elif use_residual:
            x2d, y1, p1 = fused_update_conv1x1(
                prev_y2, prev_scale, prev_shift, x2d, w1,
                row_tile=row_tile, use_residual=True, vmem_limit=vmem_limit)
        else:
            y1, p1 = fused_update_conv1x1(
                prev_y2, prev_scale, prev_shift, None, w1,
                row_tile=row_tile, use_residual=False, vmem_limit=vmem_limit)
        scale1, shift1 = _bn_scale_shift(p1, g1, b1, r)

        # Stage 2: BN1+act -> 3x3 conv (im2col single matmul) + stats.
        y1_4d = y1.reshape(n, hgt, wdt, cmid)             # metadata-only reshape
        y2, p2 = conv3x3_stats(y1_4d, w2f, scale1, shift1,
                               h_tile=h_tile, cout_tile=cout_tile,
                               act_dtype=act_dtype, vmem_limit=vmem_limit)
        prev_scale, prev_shift = _bn_scale_shift(p2, g2, b2, r)
        prev_y2 = y2.reshape(r, c)

    # Final repeat's BN2 + LeakyReLU (+ residual): only place Kernel C runs.
    out2d = bn_act_residual(prev_y2, prev_scale, prev_shift,
                            x2d if use_residual else None,
                            row_tile=row_tile, vmem_limit=vmem_limit)

    out = out2d.reshape(n, hgt, wdt, c).transpose(0, 3, 1, 2)
    return out.astype(x_nchw.dtype)


# ----------------------------------------------------------------------------
# Parameter init + pure-JAX reference (for correctness check)
# ----------------------------------------------------------------------------
def init_params(key, channels, num_repeats):
    mid = channels // 2
    params = []
    for _ in range(num_repeats):
        k1, k2, key = jax.random.split(key, 3)
        w1 = jax.random.normal(k1, (channels, mid), jnp.float32) * 0.1   # (Cin, Cmid)
        g1 = jnp.ones((mid,), jnp.float32)
        b1 = jnp.zeros((mid,), jnp.float32)
        w2 = jax.random.normal(k2, (3, 3, mid, channels), jnp.float32) * 0.1
        g2 = jnp.ones((channels,), jnp.float32)
        b2 = jnp.zeros((channels,), jnp.float32)
        params.append((w1, g1, b1, w2, g2, b2))
    return params


def _ref_forward(x_nchw, params, use_residual=True):
    def bn_lrelu(y):  # y: NCHW, training-mode BN (gamma=1, beta=0)
        mean = jnp.mean(y, axis=(0, 2, 3), keepdims=True)
        var = jnp.mean((y - mean) ** 2, axis=(0, 2, 3), keepdims=True)
        y = (y - mean) * jax.lax.rsqrt(var + EPS)
        return jnp.where(y > 0, y, NEG_SLOPE * y)

    x = x_nchw
    for (w1, _, _, w2, _, _) in params:
        k1 = jnp.transpose(w1, (1, 0))[:, :, None, None]            # OIHW
        h = jax.lax.conv_general_dilated(x, k1, (1, 1), "VALID",
                                         dimension_numbers=("NCHW", "OIHW", "NCHW"))
        h = bn_lrelu(h)
        k2 = jnp.transpose(w2, (3, 2, 0, 1))                        # OIHW
        y = jax.lax.conv_general_dilated(h, k2, (1, 1), ((1, 1), (1, 1)),
                                         dimension_numbers=("NCHW", "OIHW", "NCHW"))
        y = bn_lrelu(y)
        x = y + x if use_residual else y
    return x


# TODO(synk): BatchNorm running_mean/running_var buffer updates (training
#             bookkeeping) are not modeled; they do not affect the forward output.

if __name__ == "__main__":
    N, C, H, W = 2, 16, 16, 16
    NUM_REPEATS = 2

    key = jax.random.PRNGKey(0)
    kx, kp = jax.random.split(key)
    x = jax.random.normal(kx, (N, C, H, W), jnp.float32)
    params = init_params(kp, C, NUM_REPEATS)

    ref_res = _ref_forward(x, params, use_residual=True)
    ref_nores = _ref_forward(x, params, use_residual=False)

    # f32 / residual path with explicit small tiles (exercises multi-tile grids,
    # H-halos and the multi-tile BN stats combine).
    fwd_f32 = jax.jit(functools.partial(residual_block_forward,
                                        use_residual=True,
                                        act_dtype=jnp.float32,
                                        row_tile=128, h_tile=4))
    out = jax.block_until_ready(fwd_f32(x, params))
    assert out.shape == (N, C, H, W)
    err = float(jnp.max(jnp.abs(out - ref_res)))
    assert err < 1e-3, f"f32 residual mismatch vs pure-JAX reference: {err}"

    # f32 / no-residual path (auto-picked tiles, fused no-residual variant).
    fwd_f32_nr = jax.jit(functools.partial(residual_block_forward,
                                           use_residual=False,
                                           act_dtype=jnp.float32))
    out_nr = jax.block_until_ready(fwd_f32_nr(x, params))
    err_nr = float(jnp.max(jnp.abs(out_nr - ref_nores)))
    assert err_nr < 1e-3, f"f32 no-residual mismatch vs reference: {err_nr}"

    # bf16 storage path (f32 accumulation / BN math): loose smoke check.
    fwd_bf16 = jax.jit(functools.partial(residual_block_forward,
                                         use_residual=True,
                                         act_dtype=jnp.bfloat16))
    out_bf16 = jax.block_until_ready(fwd_bf16(x, params))
    assert bool(jnp.all(jnp.isfinite(out_bf16.astype(jnp.float32))))
    err_bf16 = float(jnp.max(jnp.abs(out_bf16.astype(jnp.float32) - ref_res)))
    assert err_bf16 < 0.3, f"bf16 mismatch vs pure-JAX reference: {err_bf16}"

    print("KERNEL_OK")
</pallas_src>

<mosaic_0001>
module attributes {stable_mosaic.version = 11 : i64} {
  func.func @_conv1x1_stats_kernel(%arg0: i32, %arg1: memref<128x16xf32, #tpu.memory_space<vmem>>, %arg2: memref<16x8xf32, #tpu.memory_space<vmem>>, %arg3: memref<128x8xf32, #tpu.memory_space<vmem>>, %arg4: memref<1x2x8xf32, #tpu.memory_space<vmem>>) attributes {dimension_semantics = [#tpu.dimension_semantics<parallel>], iteration_bounds = array<i64: 4>, scalar_prefetch = 0 : i64, scratch_operands = 0 : i64, tpu.core_type = #tpu.core_type<tc>, window_params = [{transform_indices = @transform_0, window_bounds = array<i64: 128, 16>}, {pipeline_mode = #tpu.pipeline_mode<synchronous>, transform_indices = @transform_1, window_bounds = array<i64: 16, 8>}, {transform_indices = @transform_2, window_bounds = array<i64: 128, 8>}, {transform_indices = @transform_3, window_bounds = array<i64: 1, 2, 8>}]} {
    %c0 = arith.constant 0 : index
    %c0_0 = arith.constant 0 : index
    %0 = vector.load %arg1[%c0, %c0_0] : memref<128x16xf32, #tpu.memory_space<vmem>>, vector<128x16xf32>
    %c0_1 = arith.constant 0 : index
    %c0_2 = arith.constant 0 : index
    %1 = vector.load %arg2[%c0_1, %c0_2] : memref<16x8xf32, #tpu.memory_space<vmem>>, vector<16x8xf32>
    %cst = arith.constant dense<0.000000e+00> : vector<128x8xf32>
    %2 = tpu.matmul %0, %1, %cst {dimension_numbers = #tpu.dot_dimension_numbers<[1], [0], [0], [1], [0, 0, 1, 1], [], []>} : vector<128x16xf32>, vector<16x8xf32>, vector<128x8xf32> -> vector<128x8xf32>
    %c0_3 = arith.constant 0 : index
    %c0_4 = arith.constant 0 : index
    %3 = vector.load %arg3[%c0_3, %c0_4] : memref<128x8xf32, #tpu.memory_space<vmem>>, vector<128x8xf32>
    tpu.vector_store %arg3[%c0_3, %c0_4], %2 {strides = array<i32>} : memref<128x8xf32, #tpu.memory_space<vmem>>, vector<128x8xf32>,
    %cst_5 = arith.constant dense<0.000000e+00> : vector<8xf32>
    %4 = vector.multi_reduction <add>, %2, %cst_5 [0] : vector<128x8xf32> to vector<8xf32>
    %5 = vector.shape_cast %4 : vector<8xf32> to vector<1x8xf32>
    %cst_6 = arith.constant 7.812500e-03 : f32
    %6 = vector.broadcast %cst_6 : f32 to vector<1x8xf32>
    %7 = arith.mulf %5, %6 : vector<1x8xf32>
    %8 = vector.broadcast %7 : vector<1x8xf32> to vector<128x8xf32>
    %9 = arith.subf %2, %8 : vector<128x8xf32>
    %10 = arith.mulf %9, %9 : vector<128x8xf32>
    %cst_7 = arith.constant dense<0.000000e+00> : vector<8xf32>
    %11 = vector.multi_reduction <add>, %10, %cst_7 [0] : vector<128x8xf32> to vector<8xf32>
    %12 = vector.shape_cast %11 : vector<8xf32> to vector<1x8xf32>
    %13 = tpu.concatenate %5, %12 in 0 : vector<1x8xf32>, vector<1x8xf32> -> vector<2x8xf32>
    %c0_8 = arith.constant 0 : index
    %c0_9 = arith.constant 0 : index
    %c0_10 = arith.constant 0 : index
    %14 = vector.load %arg4[%c0_8, %c0_9, %c0_10] : memref<1x2x8xf32, #tpu.memory_space<vmem>>, vector<1x2x8xf32>
    %15 = vector.shape_cast %14 : vector<1x2x8xf32> to vector<2x8xf32>
    %16 = vector.shape_cast %13 : vector<2x8xf32> to vector<1x2x8xf32>
    tpu.vector_store %arg4[%c0_8, %c0_9, %c0_10], %16 {strides = array<i32>} : memref<1x2x8xf32, #tpu.memory_space<vmem>>, vector<1x2x8xf32>,
    return
  }
  func.func @transform_0(%arg0: i32) -> (i32, i32) {
    %c0_i32 = arith.constant 0 : i32
    %c0_i32_0 = arith.constant 0 : i32
    return %arg0, %c0_i32 : i32, i32
  }
  func.func @transform_1(%arg0: i32) -> (i32, i32) {
    %c0_i32 = arith.constant 0 : i32
    %c0_i32_0 = arith.constant 0 : i32
    %c0_i32_1 = arith.constant 0 : i32
    return %c0_i32, %c0_i32_0 : i32, i32
  }
  func.func @transform_2(%arg0: i32) -> (i32, i32) {
    %c0_i32 = arith.constant 0 : i32
    %c0_i32_0 = arith.constant 0 : i32
    return %arg0, %c0_i32 : i32, i32
  }
  func.func @transform_3(%arg0: i32) -> (i32, i32, i32) {
    %c0_i32 = arith.constant 0 : i32
    %c0_i32_0 = arith.constant 0 : i32
    %c0_i32_1 = arith.constant 0 : i32
    return %arg0, %c0_i32, %c0_i32_0 : i32, i32, i32
  }
}

module attributes {stable_mosaic.version = 11 : i64} {
  func.func @_conv3x3_stats_kernel(%arg0: i32, %arg1: i32, %arg2: i32, %arg3: memref<1x4x16x8xf32, #tpu.memory_space<vmem>>, %arg4: memref<1x1x16x8xf32, #tpu.memory_space<vmem>>, %arg5: memref<1x1x16x8xf32, #tpu.memory_space<vmem>>, %arg6: memref<72x16xf32, #tpu.memory_space<vmem>>, %arg7: memref<1x8xf32, #tpu.memory_space<vmem>>, %arg8: memref<1x8xf32, #tpu.memory_space<vmem>>, %arg9: memref<1x4x16x16xf32, #tpu.memory_space<vmem>>, %arg10: memref<1x1x2x16xf32, #tpu.memory_space<vmem>>, %arg11: memref<6x18x8xf32, #tpu.memory_space<vmem>>, %arg12: memref<4x16x72xf32, #tpu.memory_space<vmem>>) attributes {dimension_semantics = [#tpu.dimension_semantics<parallel>, #tpu.dimension_semantics<parallel>, #tpu.dimension_semantics<arbitrary>], iteration_bounds = array<i64: 2, 4, 1>, scalar_prefetch = 0 : i64, scratch_operands = 2 : i64, tpu.core_type = #tpu.core_type<tc>, window_params = [{transform_indices = @transform_0, window_bounds = array<i64: 1, 4, 16, 8>}, {transform_indices = @transform_1, window_bounds = array<i64: 1, 1, 16, 8>}, {transform_indices = @transform_2, window_bounds = array<i64: 1, 1, 16, 8>}, {transform_indices = @transform_3, window_bounds = array<i64: 72, 16>}, {pipeline_mode = #tpu.pipeline_mode<synchronous>, transform_indices = @transform_4, window_bounds = array<i64: 1, 8>}, {pipeline_mode = #tpu.pipeline_mode<synchronous>, transform_indices = @transform_5, window_bounds = array<i64: 1, 8>}, {transform_indices = @transform_6, window_bounds = array<i64: 1, 4, 16, 16>}, {transform_indices = @transform_7, window_bounds = array<i64: 1, 1, 2, 16>}]} {
    %c0_i32 = arith.constant 0 : i32
    %0 = arith.cmpi eq, %arg2, %c0_i32 : i32
    %1 = arith.extui %0 : i1 to i32
    %c0_i32_0 = arith.constant 0 : i32
    %2 = arith.cmpi ne, %1, %c0_i32_0 : i32
    scf.if %2 {
      %cst_16 = arith.constant 0.000000e+00 : f32
      %24 = vector.broadcast %cst_16 : f32 to vector<6x1x8xf32>
      %c0_17 = arith.constant 0 : index
      %c0_18 = arith.constant 0 : index
      %c0_19 = arith.constant 0 : index
      %25 = vector.load %arg11[%c0_17, %c0_18, %c0_19] : memref<6x18x8xf32, #tpu.memory_space<vmem>>, vector<6x1x8xf32>
      tpu.vector_store %arg11[%c0_17, %c0_18, %c0_19], %24 {strides = array<i32>} : memref<6x18x8xf32, #tpu.memory_space<vmem>>, vector<6x1x8xf32>,
      %c0_20 = arith.constant 0 : index
      %c17 = arith.constant 17 : index
      %c0_21 = arith.constant 0 : index
      %26 = vector.load %arg11[%c0_20, %c17, %c0_21] : memref<6x18x8xf32, #tpu.memory_space<vmem>>, vector<6x1x8xf32>
      tpu.vector_store %arg11[%c0_20, %c17, %c0_21], %24 {strides = array<i32>} : memref<6x18x8xf32, #tpu.memory_space<vmem>>, vector<6x1x8xf32>,
      %c0_22 = arith.constant 0 : index
      %c0_23 = arith.constant 0 : index
      %c0_24 = arith.constant 0 : index
      %c0_25 = arith.constant 0 : index
      %27 = vector.load %arg3[%c0_22, %c0_23, %c0_24, %c0_25] : memref<1x4x16x8xf32, #tpu.memory_space<vmem>>, vector<1x4x16x8xf32>
      %28 = vector.shape_cast %27 : vector<1x4x16x8xf32> to vector<4x16x8xf32>
      %c0_26 = arith.constant 0 : index
      %c0_27 = arith.constant 0 : index
      %29 = vector.load %arg7[%c0_26, %c0_27] : memref<1x8xf32, #tpu.memory_space<vmem>>, vector<1x8xf32>
      %30 = vector.shape_cast %29 : vector<1x8xf32> to vector<1x1x8xf32>
      %31 = vector.broadcast %30 : vector<1x1x8xf32> to vector<4x16x8xf32>
      %32 = arith.mulf %28, %31 : vector<4x16x8xf32>
      %c0_28 = arith.constant 0 : index
      %c0_29 = arith.constant 0 : index
      %33 = vector.load %arg8[%c0_28, %c0_29] : memref<1x8xf32, #tpu.memory_space<vmem>>, vector<1x8xf32>
      %34 = vector.shape_cast %33 : vector<1x8xf32> to vector<1x1x8xf32>
      %35 = vector.broadcast %34 : vector<1x1x8xf32> to vector<4x16x8xf32>
      %36 = arith.addf %32, %35 : vector<4x16x8xf32>
      %cst_30 = arith.constant 0.000000e+00 : f32
      %37 = vector.broadcast %cst_30 : f32 to vector<4x16x8xf32>
      %38 = arith.cmpf ogt, %36, %37 : vector<4x16x8xf32>
      %cst_31 = arith.constant 1.000000e-01 : f32
      %39 = vector.broadcast %cst_31 : f32 to vector<4x16x8xf32>
      %40 = arith.mulf %39, %36 : vector<4x16x8xf32>
      %41 = arith.select %38, %36, %40 : vector<4x16x8xi1>, vector<4x16x8xf32>
      %c1 = arith.constant 1 : index
      %c1_32 = arith.constant 1 : index
      %c0_33 = arith.constant 0 : index
      %42 = vector.load %arg11[%c1, %c1_32, %c0_33] : memref<6x18x8xf32, #tpu.memory_space<vmem>>, vector<4x16x8xf32>
      tpu.vector_store %arg11[%c1, %c1_32, %c0_33], %41 {strides = array<i32>} : memref<6x18x8xf32, #tpu.memory_space<vmem>>, vector<4x16x8xf32>,
      %c0_34 = arith.constant 0 : index
      %c0_35 = arith.constant 0 : index
      %c0_36 = arith.constant 0 : index
      %c0_37 = arith.constant 0 : index
      %43 = vector.load %arg4[%c0_34, %c0_35, %c0_36, %c0_37] : memref<1x1x16x8xf32, #tpu.memory_space<vmem>>, vector<1x1x16x8xf32>
      %44 = vector.shape_cast %43 : vector<1x1x16x8xf32> to vector<1x16x8xf32>
      %c0_38 = arith.constant 0 : index
      %c0_39 = arith.constant 0 : index
      %45 = vector.load %arg7[%c0_38, %c0_39] : memref<1x8xf32, #tpu.memory_space<vmem>>, vector<1x8xf32>
      %46 = vector.shape_cast %45 : vector<1x8xf32> to vector<1x1x8xf32>
      %47 = vector.broadcast %46 : vector<1x1x8xf32> to vector<1x16x8xf32>
      %48 = arith.mulf %44, %47 : vector<1x16x8xf32>
      %c0_40 = arith.constant 0 : index
      %c0_41 = arith.constant 0 : index
      %49 = vector.load %arg8[%c0_40, %c0_41] : memref<1x8xf32, #tpu.memory_space<vmem>>, vector<1x8xf32>
      %50 = vector.shape_cast %49 : vector<1x8xf32> to vector<1x1x8xf32>
      %51 = vector.broadcast %50 : vector<1x1x8xf32> to vector<1x16x8xf32>
      %52 = arith.addf %48, %51 : vector<1x16x8xf32>
      %cst_42 = arith.constant 0.000000e+00 : f32
      %53 = vector.broadcast %cst_42 : f32 to vector<1x16x8xf32>
      %54 = arith.cmpf ogt, %52, %53 : vector<1x16x8xf32>
      %cst_43 = arith.constant 1.000000e-01 : f32
      %55 = vector.broadcast %cst_43 : f32 to vector<1x16x8xf32>
      %56 = arith.mulf %55, %52 : vector<1x16x8xf32>
      %57 = arith.select %54, %52, %56 : vector<1x16x8xi1>, vector<1x16x8xf32>
      %c0_44 = arith.constant 0 : index
      %c0_45 = arith.constant 0 : index
      %c0_46 = arith.constant 0 : index
      %c0_47 = arith.constant 0 : index
      %58 = vector.load %arg5[%c0_44, %c0_45, %c0_46, %c0_47] : memref<1x1x16x8xf32, #tpu.memory_space<vmem>>, vector<1x1x16x8xf32>
      %59 = vector.shape_cast %58 : vector<1x1x16x8xf32> to vector<1x16x8xf32>
      %c0_48 = arith.constant 0 : index
      %c0_49 = arith.constant 0 : index
      %60 = vector.load %arg7[%c0_48, %c0_49] : memref<1x8xf32, #tpu.memory_space<vmem>>, vector<1x8xf32>
      %61 = vector.shape_cast %60 : vector<1x8xf32> to vector<1x1x8xf32>
      %62 = vector.broadcast %61 : vector<1x1x8xf32> to vector<1x16x8xf32>
      %63 = arith.mulf %59, %62 : vector<1x16x8xf32>
      %c0_50 = arith.constant 0 : index
      %c0_51 = arith.constant 0 : index
      %64 = vector.load %arg8[%c0_50, %c0_51] : memref<1x8xf32, #tpu.memory_space<vmem>>, vector<1x8xf32>
      %65 = vector.shape_cast %64 : vector<1x8xf32> to vector<1x1x8xf32>
      %66 = vector.broadcast %65 : vector<1x1x8xf32> to vector<1x16x8xf32>
      %67 = arith.addf %63, %66 : vector<1x16x8xf32>
      %cst_52 = arith.constant 0.000000e+00 : f32
      %68 = vector.broadcast %cst_52 : f32 to vector<1x16x8xf32>
      %69 = arith.cmpf ogt, %67, %68 : vector<1x16x8xf32>
      %cst_53 = arith.constant 1.000000e-01 : f32
      %70 = vector.broadcast %cst_53 : f32 to vector<1x16x8xf32>
      %71 = arith.mulf %70, %67 : vector<1x16x8xf32>
      %72 = arith.select %69, %67, %71 : vector<1x16x8xi1>, vector<1x16x8xf32>
      %c0_i32_54 = arith.constant 0 : i32
      %73 = arith.cmpi sgt, %arg1, %c0_i32_54 : i32
      %cst_55 = arith.constant 0.000000e+00 : f32
      %74 = vector.broadcast %cst_55 : f32 to vector<1x16x8xf32>
      %75 = arith.select %73, %57, %74 : vector<1x16x8xf32>
      %c0_56 = arith.constant 0 : index
      %c1_57 = arith.constant 1 : index
      %c0_58 = arith.constant 0 : index
      %76 = vector.load %arg11[%c0_56, %c1_57, %c0_58] : memref<6x18x8xf32, #tpu.memory_space<vmem>>, vector<1x16x8xf32>
      tpu.vector_store %arg11[%c0_56, %c1_57, %c0_58], %75 {strides = array<i32>} : memref<6x18x8xf32, #tpu.memory_space<vmem>>, vector<1x16x8xf32>,
      %c3_i32 = arith.constant 3 : i32
      %77 = arith.cmpi slt, %arg1, %c3_i32 : i32
      %cst_59 = arith.constant 0.000000e+00 : f32
      %78 = vector.broadcast %cst_59 : f32 to vector<1x16x8xf32>
      %79 = arith.select %77, %72, %78 : vector<1x16x8xf32>
      %c5 = arith.constant 5 : index
      %c1_60 = arith.constant 1 : index
      %c0_61 = arith.constant 0 : index
      %80 = vector.load %arg11[%c5, %c1_60, %c0_61] : memref<6x18x8xf32, #tpu.memory_space<vmem>>, vector<1x16x8xf32>
      tpu.vector_store %arg11[%c5, %c1_60, %c0_61], %79 {strides = array<i32>} : memref<6x18x8xf32, #tpu.memory_space<vmem>>, vector<1x16x8xf32>,
      %c0_62 = arith.constant 0 : index
      %c0_63 = arith.constant 0 : index
      %c0_64 = arith.constant 0 : index
      %81 = vector.load %arg11[%c0_62, %c0_63, %c0_64] : memref<6x18x8xf32, #tpu.memory_space<vmem>>, vector<4x16x8xf32>
      %c0_65 = arith.constant 0 : index
      %c0_66 = arith.constant 0 : index
      %c0_67 = arith.constant 0 : index
      %82 = vector.load %arg12[%c0_65, %c0_66, %c0_67] : memref<4x16x72xf32, #tpu.memory_space<vmem>>, vector<4x16x8xf32>
      tpu.vector_store %arg12[%c0_65, %c0_66, %c0_67], %81 {strides = array<i32>} : memref<4x16x72xf32, #tpu.memory_space<vmem>>, vector<4x16x8xf32>,
      %c0_68 = arith.constant 0 : index
      %c1_69 = arith.constant 1 : index
      %c0_70 = arith.constant 0 : index
      %83 = vector.load %arg11[%c0_68, %c1_69, %c0_70] : memref<6x18x8xf32, #tpu.memory_space<vmem>>, vector<4x16x8xf32>
      %c0_71 = arith.constant 0 : index
      %c0_72 = arith.constant 0 : index
      %c8 = arith.constant 8 : index
      %84 = vector.load %arg12[%c0_71, %c0_72, %c8] : memref<4x16x72xf32, #tpu.memory_space<vmem>>, vector<4x16x8xf32>
      tpu.vector_store %arg12[%c0_71, %c0_72, %c8], %83 {strides = array<i32>} : memref<4x16x72xf32, #tpu.memory_space<vmem>>, vector<4x16x8xf32>,
      %c0_73 = arith.constant 0 : index
      %c2 = arith.constant 2 : index
      %c0_74 = arith.constant 0 : index
      %85 = vector.load %arg11[%c0_73, %c2, %c0_74] : memref<6x18x8xf32, #tpu.memory_space<vmem>>, vector<4x16x8xf32>
      %c0_75 = arith.constant 0 : index
      %c0_76 = arith.constant 0 : index
      %c16 = arith.constant 16 : index
      %86 = vector.load %arg12[%c0_75, %c0_76, %c16] : memref<4x16x72xf32, #tpu.memory_space<vmem>>, vector<4x16x8xf32>
      tpu.vector_store %arg12[%c0_75, %c0_76, %c16], %85 {strides = array<i32>} : memref<4x16x72xf32, #tpu.memory_space<vmem>>, vector<4x16x8xf32>,
      %c1_77 = arith.constant 1 : index
      %c0_78 = arith.constant 0 : index
      %c0_79 = arith.constant 0 : index
      %87 = vector.load %arg11[%c1_77, %c0_78, %c0_79] : memref<6x18x8xf32, #tpu.memory_space<vmem>>, vector<4x16x8xf32>
      %c0_80 = arith.constant 0 : index
      %c0_81 = arith.constant 0 : index
      %c24 = arith.constant 24 : index
      %88 = vector.load %arg12[%c0_80, %c0_81, %c24] : memref<4x16x72xf32, #tpu.memory_space<vmem>>, vector<4x16x8xf32>
      tpu.vector_store %arg12[%c0_80, %c0_81, %c24], %87 {strides = array<i32>} : memref<4x16x72xf32, #tpu.memory_space<vmem>>, vector<4x16x8xf32>,
      %c1_82 = arith.constant 1 : index
      %c1_83 = arith.constant 1 : index
      %c0_84 = arith.constant 0 : index
      %89 = vector.load %arg11[%c1_82, %c1_83, %c0_84] : memref<6x18x8xf32, #tpu.memory_space<vmem>>, vector<4x16x8xf32>
      %c0_85 = arith.constant 0 : index
      %c0_86 = arith.constant 0 : index
      %c32 = arith.constant 32 : index
      %90 = vector.load %arg12[%c0_85, %c0_86, %c32] : memref<4x16x72xf32, #tpu.memory_space<vmem>>, vector<4x16x8xf32>
      tpu.vector_store %arg12[%c0_85, %c0_86, %c32], %89 {strides = array<i32>} : memref<4x16x72xf32, #tpu.memory_space<vmem>>, vector<4x16x8xf32>,
      %c1_87 = arith.constant 1 : index
      %c2_88 = arith.constant 2 : index
      %c0_89 = arith.constant 0 : index
      %91 = vector.load %arg11[%c1_87, %c2_88, %c0_89] : memref<6x18x8xf32, #tpu.memory_space<vmem>>, vector<4x16x8xf32>
      %c0_90 = arith.constant 0 : index
      %c0_91 = arith.constant 0 : index
      %c40 = arith.constant 40 : index
      %92 = vector.load %arg12[%c0_90, %c0_91, %c40] : memref<4x16x72xf32, #tpu.memory_space<vmem>>, vector<4x16x8xf32>
      tpu.vector_store %arg12[%c0_90, %c0_91, %c40], %91 {strides = array<i32>} : memref<4x16x72xf32, #tpu.memory_space<vmem>>, vector<4x16x8xf32>,
      %c2_92 = arith.constant 2 : index
      %c0_93 = arith.constant 0 : index
      %c0_94 = arith.constant 0 : index
      %93 = vector.load %arg11[%c2_92, %c0_93, %c0_94] : memref<6x18x8xf32, #tpu.memory_space<vmem>>, vector<4x16x8xf32>
      %c0_95 = arith.constant 0 : index
      %c0_96 = arith.constant 0 : index
      %c48 = arith.constant 48 : index
      %94 = vector.load %arg12[%c0_95, %c0_96, %c48] : memref<4x16x72xf32, #tpu.memory_space<vmem>>, vector<4x16x8xf32>
      tpu.vector_store %arg12[%c0_95, %c0_96, %c48], %93 {strides = array<i32>} : memref<4x16x72xf32, #tpu.memory_space<vmem>>, vector<4x16x8xf32>,
      %c2_97 = arith.constant 2 : index
      %c1_98 = arith.constant 1 : index
      %c0_99 = arith.constant 0 : index
      %95 = vector.load %arg11[%c2_97, %c1_98, %c0_99] : memref<6x18x8xf32, #tpu.memory_space<vmem>>, vector<4x16x8xf32>
      %c0_100 = arith.constant 0 : index
      %c0_101 = arith.constant 0 : index
      %c56 = arith.constant 56 : index
      %96 = vector.load %arg12[%c0_100, %c0_101, %c56] : memref<4x16x72xf32, #tpu.memory_space<vmem>>, vector<4x16x8xf32>
      tpu.vector_store %arg12[%c0_100, %c0_101, %c56], %95 {strides = array<i32>} : memref<4x16x72xf32, #tpu.memory_space<vmem>>, vector<4x16x8xf32>,
      %c2_102 = arith.constant 2 : index
      %c2_103 = arith.constant 2 : index
      %c0_104 = arith.constant 0 : index
      %97 = vector.load %arg11[%c2_102, %c2_103, %c0_104] : memref<6x18x8xf32, #tpu.memory_space<vmem>>, vector<4x16x8xf32>
      %c0_105 = arith.constant 0 : index
      %c0_106 = arith.constant 0 : index
      %c64 = arith.constant 64 : index
      %98 = vector.load %arg12[%c0_105, %c0_106, %c64] : memref<4x16x72xf32, #tpu.memory_space<vmem>>, vector<4x16x8xf32>
      tpu.vector_store %arg12[%c0_105, %c0_106, %c64], %97 {strides = array<i32>} : memref<4x16x72xf32, #tpu.memory_space<vmem>>, vector<4x16x8xf32>,
    } else {
    }
    %c0 = arith.constant 0 : index
    %c0_1 = arith.constant 0 : index
    %c0_2 = arith.constant 0 : index
    %3 = vector.load %arg12[%c0, %c0_1, %c0_2] : memref<4x16x72xf32, #tpu.memory_space<vmem>>, vector<4x16x72xf32>
    %4 = vector.shape_cast %3 : vector<4x16x72xf32> to vector<64x72xf32>
    %c0_3 = arith.constant 0 : index
    %c0_4 = arith.constant 0 : index
    %5 = vector.load %arg6[%c0_3, %c0_4] : memref<72x16xf32, #tpu.memory_space<vmem>>, vector<72x16xf32>
    %cst = arith.constant dense<0.000000e+00> : vector<64x16xf32>
    %6 = tpu.matmul %4, %5, %cst {dimension_numbers = #tpu.dot_dimension_numbers<[1], [0], [0], [1], [0, 0, 1, 1], [], []>} : vector<64x72xf32>, vector<72x16xf32>, vector<64x16xf32> -> vector<64x16xf32>
    %7 = vector.shape_cast %6 : vector<64x16xf32> to vector<4x16x16xf32>
    %c0_5 = arith.constant 0 : index
    %c0_6 = arith.constant 0 : index
    %c0_7 = arith.constant 0 : index
    %c0_8 = arith.constant 0 : index
    %8 = vector.load %arg9[%c0_5, %c0_6, %c0_7, %c0_8] : memref<1x4x16x16xf32, #tpu.memory_space<vmem>>, vector<1x4x16x16xf32>
    %9 = vector.shape_cast %8 : vector<1x4x16x16xf32> to vector<4x16x16xf32>
    %10 = vector.shape_cast %7 : vector<4x16x16xf32> to vector<1x4x16x16xf32>
    tpu.vector_store %arg9[%c0_5, %c0_6, %c0_7, %c0_8], %10 {strides = array<i32>} : memref<1x4x16x16xf32, #tpu.memory_space<vmem>>, vector<1x4x16x16xf32>,
    %cst_9 = arith.constant dense<0.000000e+00> : vector<16xf32>
    %11 = vector.multi_reduction <add>, %6, %cst_9 [0] : vector<64x16xf32> to vector<16xf32>
    %12 = vector.shape_cast %11 : vector<16xf32> to vector<1x16xf32>
    %cst_10 = arith.constant 1.562500e-02 : f32
    %13 = vector.broadcast %cst_10 : f32 to vector<1x16xf32>
    %14 = arith.mulf %12, %13 : vector<1x16xf32>
    %15 = vector.broadcast %14 : vector<1x16xf32> to vector<64x16xf32>
    %16 = arith.subf %6, %15 : vector<64x16xf32>
    %17 = arith.mulf %16, %16 : vector<64x16xf32>
    %cst_11 = arith.constant dense<0.000000e+00> : vector<16xf32>
    %18 = vector.multi_reduction <add>, %17, %cst_11 [0] : vector<64x16xf32> to vector<16xf32>
    %19 = vector.shape_cast %18 : vector<16xf32> to vector<1x16xf32>
    %20 = tpu.concatenate %12, %19 in 0 : vector<1x16xf32>, vector<1x16xf32> -> vector<2x16xf32>
    %c0_12 = arith.constant 0 : index
    %c0_13 = arith.constant 0 : index
    %c0_14 = arith.constant 0 : index
    %c0_15 = arith.constant 0 : index
    %21 = vector.load %arg10[%c0_12, %c0_13, %c0_14, %c0_15] : memref<1x1x2x16xf32, #tpu.memory_space<vmem>>, vector<1x1x2x16xf32>
    %22 = vector.shape_cast %21 : vector<1x1x2x16xf32> to vector<2x16xf32>
    %23 = vector.shape_cast %20 : vector<2x16xf32> to vector<1x1x2x16xf32>
    tpu.vector_store %arg10[%c0_12, %c0_13, %c0_14, %c0_15], %23 {strides = array<i32>} : memref<1x1x2x16xf32, #tpu.memory_space<vmem>>, vector<1x1x2x16xf32>,
    return
  }
  func.func @transform_0(%arg0: i32, %arg1: i32, %arg2: i32) -> (i32, i32, i32, i32) {
    %c0_i32 = arith.constant 0 : i32
    %c0_i32_0 = arith.constant 0 : i32
    %c0_i32_1 = arith.constant 0 : i32
    return %arg0, %arg1, %c0_i32, %c0_i32_0 : i32, i32, i32, i32
  }
  func.func @transform_1(%arg0: i32, %arg1: i32, %arg2: i32) -> (i32, i32, i32, i32) {
    %c4_i32 = arith.constant 4 : i32
    %0 = arith.muli %arg1, %c4_i32 : i32
    %c1_i32 = arith.constant 1 : i32
    %1 = arith.subi %0, %c1_i32 : i32
    %c0_i32 = arith.constant 0 : i32
    %2 = arith.maxsi %1, %c0_i32 : i32
    %c0_i32_0 = arith.constant 0 : i32
    %c0_i32_1 = arith.constant 0 : i32
    %c0_i32_2 = arith.constant 0 : i32
    return %arg0, %2, %c0_i32_0, %c0_i32_1 : i32, i32, i32, i32
  }
  func.func @transform_2(%arg0: i32, %arg1: i32, %arg2: i32) -> (i32, i32, i32, i32) {
    %c1_i32 = arith.constant 1 : i32
    %0 = arith.addi %arg1, %c1_i32 : i32
    %c4_i32 = arith.constant 4 : i32
    %1 = arith.muli %0, %c4_i32 : i32
    %c15_i32 = arith.constant 15 : i32
    %2 = arith.minsi %1, %c15_i32 : i32
    %c0_i32 = arith.constant 0 : i32
    %c0_i32_0 = arith.constant 0 : i32
    %c0_i32_1 = arith.constant 0 : i32
    return %arg0, %2, %c0_i32, %c0_i32_0 : i32, i32, i32, i32
  }
  func.func @transform_3(%arg0: i32, %arg1: i32, %arg2: i32) -> (i32, i32) {
    %c0_i32 = arith.constant 0 : i32
    %c0_i32_0 = arith.constant 0 : i32
    return %c0_i32, %arg2 : i32, i32
  }
  func.func @transform_4(%arg0: i32, %arg1: i32, %arg2: i32) -> (i32, i32) {
    %c0_i32 = arith.constant 0 : i32
    %c0_i32_0 = arith.constant 0 : i32
    %c0_i32_1 = arith.constant 0 : i32
    return %c0_i32, %c0_i32_0 : i32, i32
  }
  func.func @transform_5(%arg0: i32, %arg1: i32, %arg2: i32) -> (i32, i32) {
    %c0_i32 = arith.constant 0 : i32
    %c0_i32_0 = arith.constant 0 : i32
    %c0_i32_1 = arith.constant 0 : i32
    return %c0_i32, %c0_i32_0 : i32, i32
  }
  func.func @transform_6(%arg0: i32, %arg1: i32, %arg2: i32) -> (i32, i32, i32, i32) {
    %c0_i32 = arith.constant 0 : i32
    %c0_i32_0 = arith.constant 0 : i32
    return %arg0, %arg1, %c0_i32, %arg2 : i32, i32, i32, i32
  }
  func.func @transform_7(%arg0: i32, %arg1: i32, %arg2: i32) -> (i32, i32, i32, i32) {
    %c0_i32 = arith.constant 0 : i32
    %c0_i32_0 = arith.constant 0 : i32
    return %arg0, %arg1, %c0_i32, %arg2 : i32, i32, i32, i32
  }
}

module attributes {stable_mosaic.version = 11 : i64} {
  func.func @_bn_act_res_kernel(%arg0: i32, %arg1: memref<128x16xf32, #tpu.memory_space<vmem>>, %arg2: memref<1x16xf32, #tpu.memory_space<vmem>>, %arg3: memref<1x16xf32, #tpu.memory_space<vmem>>, %arg4: memref<128x16xf32, #tpu.memory_space<vmem>>, %arg5: memref<128x16xf32, #tpu.memory_space<vmem>>) attributes {dimension_semantics = [#tpu.dimension_semantics<parallel>], iteration_bounds = array<i64: 4>, scalar_prefetch = 0 : i64, scratch_operands = 0 : i64, tpu.core_type = #tpu.core_type<tc>, window_params = [{transform_indices = @transform_0, window_bounds = array<i64: 128, 16>}, {pipeline_mode = #tpu.pipeline_mode<synchronous>, transform_indices = @transform_1, window_bounds = array<i64: 1, 16>}, {pipeline_mode = #tpu.pipeline_mode<synchronous>, transform_indices = @transform_2, window_bounds = array<i64: 1, 16>}, {transform_indices = @transform_3, window_bounds = array<i64: 128, 16>}, {transform_indices = @transform_4, window_bounds = array<i64: 128, 16>}]} {
    %c0 = arith.constant 0 : index
    %c0_0 = arith.constant 0 : index
    %0 = vector.load %arg1[%c0, %c0_0] : memref<128x16xf32, #tpu.memory_space<vmem>>, vector<128x16xf32>
    %c0_1 = arith.constant 0 : index
    %c0_2 = arith.constant 0 : index
    %1 = vector.load %arg2[%c0_1, %c0_2] : memref<1x16xf32, #tpu.memory_space<vmem>>, vector<1x16xf32>
    %2 = vector.broadcast %1 : vector<1x16xf32> to vector<128x16xf32>
    %3 = arith.mulf %0, %2 : vector<128x16xf32>
    %c0_3 = arith.constant 0 : index
    %c0_4 = arith.constant 0 : index
    %4 = vector.load %arg3[%c0_3, %c0_4] : memref<1x16xf32, #tpu.memory_space<vmem>>, vector<1x16xf32>
    %5 = vector.broadcast %4 : vector<1x16xf32> to vector<128x16xf32>
    %6 = arith.addf %3, %5 : vector<128x16xf32>
    %cst = arith.constant 0.000000e+00 : f32
    %7 = vector.broadcast %cst : f32 to vector<128x16xf32>
    %8 = arith.cmpf ogt, %6, %7 : vector<128x16xf32>
    %cst_5 = arith.constant 1.000000e-01 : f32
    %9 = vector.broadcast %cst_5 : f32 to vector<128x16xf32>
    %10 = arith.mulf %9, %6 : vector<128x16xf32>
    %11 = arith.select %8, %6, %10 : vector<128x16xi1>, vector<128x16xf32>
    %c0_6 = arith.constant 0 : index
    %c0_7 = arith.constant 0 : index
    %12 = vector.load %arg4[%c0_6, %c0_7] : memref<128x16xf32, #tpu.memory_space<vmem>>, vector<128x16xf32>
    %13 = arith.addf %11, %12 : vector<128x16xf32>
    %c0_8 = arith.constant 0 : index
    %c0_9 = arith.constant 0 : index
    %14 = vector.load %arg5[%c0_8, %c0_9] : memref<128x16xf32, #tpu.memory_space<vmem>>, vector<128x16xf32>
    tpu.vector_store %arg5[%c0_8, %c0_9], %13 {strides = array<i32>} : memref<128x16xf32, #tpu.memory_space<vmem>>, vector<128x16xf32>,
    return
  }
  func.func @transform_0(%arg0: i32) -> (i32, i32) {
    %c0_i32 = arith.constant 0 : i32
    %c0_i32_0 = arith.constant 0 : i32
    return %arg0, %c0_i32 : i32, i32
  }
  func.func @transform_1(%arg0: i32) -> (i32, i32) {
    %c0_i32 = arith.constant 0 : i32
    %c0_i32_0 = arith.constant 0 : i32
    %c0_i32_1 = arith.constant 0 : i32
    return %c0_i32, %c0_i32_0 : i32, i32
  }
  func.func @transform_2(%arg0: i32) -> (i32, i32) {
    %c0_i32 = arith.constant 0 : i32
    %c0_i32_0 = arith.constant 0 : i32
    %c0_i32_1 = arith.constant 0 : i32
    return %c0_i32, %c0_i32_0 : i32, i32
  }
  func.func @transform_3(%arg0: i32) -> (i32, i32) {
    %c0_i32 = arith.constant 0 : i32
    %c0_i32_0 = arith.constant 0 : i32
    return %arg0, %c0_i32 : i32, i32
  }
  func.func @transform_4(%arg0: i32) -> (i32, i32) {
    %c0_i32 = arith.constant 0 : i32
    %c0_i32_0 = arith.constant 0 : i32
    return %arg0, %c0_i32 : i32, i32
  }
}

module attributes {stable_mosaic.version = 11 : i64} {
  func.func @_fused_update_conv1x1_kernel(%arg0: i32, %arg1: memref<128x16xf32, #tpu.memory_space<vmem>>, %arg2: memref<1x16xf32, #tpu.memory_space<vmem>>, %arg3: memref<1x16xf32, #tpu.memory_space<vmem>>, %arg4: memref<128x16xf32, #tpu.memory_space<vmem>>, %arg5: memref<16x8xf32, #tpu.memory_space<vmem>>, %arg6: memref<128x16xf32, #tpu.memory_space<vmem>>, %arg7: memref<128x8xf32, #tpu.memory_space<vmem>>, %arg8: memref<1x2x8xf32, #tpu.memory_space<vmem>>) attributes {dimension_semantics = [#tpu.dimension_semantics<parallel>], iteration_bounds = array<i64: 4>, scalar_prefetch = 0 : i64, scratch_operands = 0 : i64, tpu.core_type = #tpu.core_type<tc>, window_params = [{transform_indices = @transform_0, window_bounds = array<i64: 128, 16>}, {pipeline_mode = #tpu.pipeline_mode<synchronous>, transform_indices = @transform_1, window_bounds = array<i64: 1, 16>}, {pipeline_mode = #tpu.pipeline_mode<synchronous>, transform_indices = @transform_2, window_bounds = array<i64: 1, 16>}, {transform_indices = @transform_3, window_bounds = array<i64: 128, 16>}, {pipeline_mode = #tpu.pipeline_mode<synchronous>, transform_indices = @transform_4, window_bounds = array<i64: 16, 8>}, {transform_indices = @transform_5, window_bounds = array<i64: 128, 16>}, {transform_indices = @transform_6, window_bounds = array<i64: 128, 8>}, {transform_indices = @transform_7, window_bounds = array<i64: 1, 2, 8>}]} {
    %c0 = arith.constant 0 : index
    %c0_0 = arith.constant 0 : index
    %0 = vector.load %arg1[%c0, %c0_0] : memref<128x16xf32, #tpu.memory_space<vmem>>, vector<128x16xf32>
    %c0_1 = arith.constant 0 : index
    %c0_2 = arith.constant 0 : index
    %1 = vector.load %arg2[%c0_1, %c0_2] : memref<1x16xf32, #tpu.memory_space<vmem>>, vector<1x16xf32>
    %2 = vector.broadcast %1 : vector<1x16xf32> to vector<128x16xf32>
    %3 = arith.mulf %0, %2 : vector<128x16xf32>
    %c0_3 = arith.constant 0 : index
    %c0_4 = arith.constant 0 : index
    %4 = vector.load %arg3[%c0_3, %c0_4] : memref<1x16xf32, #tpu.memory_space<vmem>>, vector<1x16xf32>
    %5 = vector.broadcast %4 : vector<1x16xf32> to vector<128x16xf32>
    %6 = arith.addf %3, %5 : vector<128x16xf32>
    %cst = arith.constant 0.000000e+00 : f32
    %7 = vector.broadcast %cst : f32 to vector<128x16xf32>
    %8 = arith.cmpf ogt, %6, %7 : vector<128x16xf32>
    %cst_5 = arith.constant 1.000000e-01 : f32
    %9 = vector.broadcast %cst_5 : f32 to vector<128x16xf32>
    %10 = arith.mulf %9, %6 : vector<128x16xf32>
    %11 = arith.select %8, %6, %10 : vector<128x16xi1>, vector<128x16xf32>
    %c0_6 = arith.constant 0 : index
    %c0_7 = arith.constant 0 : index
    %12 = vector.load %arg4[%c0_6, %c0_7] : memref<128x16xf32, #tpu.memory_space<vmem>>, vector<128x16xf32>
    %13 = arith.addf %11, %12 : vector<128x16xf32>
    %c0_8 = arith.constant 0 : index
    %c0_9 = arith.constant 0 : index
    %14 = vector.load %arg6[%c0_8, %c0_9] : memref<128x16xf32, #tpu.memory_space<vmem>>, vector<128x16xf32>
    tpu.vector_store %arg6[%c0_8, %c0_9], %13 {strides = array<i32>} : memref<128x16xf32, #tpu.memory_space<vmem>>, vector<128x16xf32>,
    %c0_10 = arith.constant 0 : index
    %c0_11 = arith.constant 0 : index
    %15 = vector.load %arg5[%c0_10, %c0_11] : memref<16x8xf32, #tpu.memory_space<vmem>>, vector<16x8xf32>
    %cst_12 = arith.constant dense<0.000000e+00> : vector<128x8xf32>
    %16 = tpu.matmul %13, %15, %cst_12 {dimension_numbers = #tpu.dot_dimension_numbers<[1], [0], [0], [1], [0, 0, 1, 1], [], []>} : vector<128x16xf32>, vector<16x8xf32>, vector<128x8xf32> -> vector<128x8xf32>
    %c0_13 = arith.constant 0 : index
    %c0_14 = arith.constant 0 : index
    %17 = vector.load %arg7[%c0_13, %c0_14] : memref<128x8xf32, #tpu.memory_space<vmem>>, vector<128x8xf32>
    tpu.vector_store %arg7[%c0_13, %c0_14], %16 {strides = array<i32>} : memref<128x8xf32, #tpu.memory_space<vmem>>, vector<128x8xf32>,
    %cst_15 = arith.constant dense<0.000000e+00> : vector<8xf32>
    %18 = vector.multi_reduction <add>, %16, %cst_15 [0] : vector<128x8xf32> to vector<8xf32>
    %19 = vector.shape_cast %18 : vector<8xf32> to vector<1x8xf32>
    %cst_16 = arith.constant 7.812500e-03 : f32
    %20 = vector.broadcast %cst_16 : f32 to vector<1x8xf32>
    %21 = arith.mulf %19, %20 : vector<1x8xf32>
    %22 = vector.broadcast %21 : vector<1x8xf32> to vector<128x8xf32>
    %23 = arith.subf %16, %22 : vector<128x8xf32>
    %24 = arith.mulf %23, %23 : vector<128x8xf32>
    %cst_17 = arith.constant dense<0.000000e+00> : vector<8xf32>
    %25 = vector.multi_reduction <add>, %24, %cst_17 [0] : vector<128x8xf32> to vector<8xf32>
    %26 = vector.shape_cast %25 : vector<8xf32> to vector<1x8xf32>
    %27 = tpu.concatenate %19, %26 in 0 : vector<1x8xf32>, vector<1x8xf32> -> vector<2x8xf32>
    %c0_18 = arith.constant 0 : index
    %c0_19 = arith.constant 0 : index
    %c0_20 = arith.constant 0 : index
    %28 = vector.load %arg8[%c0_18, %c0_19, %c0_20] : memref<1x2x8xf32, #tpu.memory_space<vmem>>, vector<1x2x8xf32>
    %29 = vector.shape_cast %28 : vector<1x2x8xf32> to vector<2x8xf32>
    %30 = vector.shape_cast %27 : vector<2x8xf32> to vector<1x2x8xf32>
    tpu.vector_store %arg8[%c0_18, %c0_19, %c0_20], %30 {strides = array<i32>} : memref<1x2x8xf32, #tpu.memory_space<vmem>>, vector<1x2x8xf32>,
    return
  }
  func.func @transform_0(%arg0: i32) -> (i32, i32) {
    %c0_i32 = arith.constant 0 : i32
    %c0_i32_0 = arith.constant 0 : i32
    return %arg0, %c0_i32 : i32, i32
  }
  func.func @transform_1(%arg0: i32) -> (i32, i32) {
    %c0_i32 = arith.constant 0 : i32
    %c0_i32_0 = arith.constant 0 : i32
    %c0_i32_1 = arith.constant 0 : i32
    return %c0_i32, %c0_i32_0 : i32, i32
  }
  func.func @transform_2(%arg0: i32) -> (i32, i32) {
    %c0_i32 = arith.constant 0 : i32
    %c0_i32_0 = arith.constant 0 : i32
    %c0_i32_1 = arith.constant 0 : i32
    return %c0_i32, %c0_i32_0 : i32, i32
  }
  func.func @transform_3(%arg0: i32) -> (i32, i32) {
    %c0_i32 = arith.constant 0 : i32
    %c0_i32_0 = arith.constant 0 : i32
    return %arg0, %c0_i32 : i32, i32
  }
  func.func @transform_4(%arg0: i32) -> (i32, i32) {
    %c0_i32 = arith.constant 0 : i32
    %c0_i32_0 = arith.constant 0 : i32
    %c0_i32_1 = arith.constant 0 : i32
    return %c0_i32, %c0_i32_0 : i32, i32
  }
  func.func @transform_5(%arg0: i32) -> (i32, i32) {
    %c0_i32 = arith.constant 0 : i32
    %c0_i32_0 = arith.constant 0 : i32
    return %arg0, %c0_i32 : i32, i32
  }
  func.func @transform_6(%arg0: i32) -> (i32, i32) {
    %c0_i32 = arith.constant 0 : i32
    %c0_i32_0 = arith.constant 0 : i32
    return %arg0, %c0_i32 : i32, i32
  }
  func.func @transform_7(%arg0: i32) -> (i32, i32, i32) {
    %c0_i32 = arith.constant 0 : i32
    %c0_i32_0 = arith.constant 0 : i32
    %c0_i32_1 = arith.constant 0 : i32
    return %arg0, %c0_i32, %c0_i32_0 : i32, i32, i32
  }
}

</mosaic_0001>

<bundles_post_ra>
// kernel: residual_block_forward.5
= control target key start
LH: loop header
LB: loop body
LE: loop exit
PB: predicated region body
PF: predicated region fallthrough
CT: control target
= control target key end

     0   :  { %s602_s12 = smov 0   ;;  %s786_s0 = inlined_call_operand.vmem [shape: f32[512,16], index: 0, kind: input, shape index: {}]   ;;  %s787_s1 = inlined_call_operand.vmem [shape: f32[16,8], index: 1, kind: input, shape index: {}]   ;;  %s788_s2 = inlined_call_operand.vmem [shape: f32[512,8], index: 2, kind: output, shape index: {0}]   ;;  %s789_s3 = inlined_call_operand.vmem [shape: f32[4,2,8], index: 3, kind: output, shape index: {1}]  }
   0x1 LB: > { %s608_s13 = sadd.s32 4294967295, %s580_s12   ;;  %p536_p0 = scmp.ge.s32.totalorder %s580_s12, 1  ;;  %s580_s12 = sphi %s602_s12, %s14_s12  }
   0x2   : > { %p141_p1 = scmp.lt.s32.totalorder %s580_s12, 5 }
   0x4   : > { %p142_p2 = pnand %p536_p0, %p141_p1 }
   0x5   : > { %s537_s18 = sshll.u32 (!%p142_p2), %s608_s13, 4  ;;  %p181_p4 = scmp.lt.s32.totalorder (!%p142_p2), %s608_s13, 3 }
   0x6   : > { %145 = sbr.rel (%p142_p2) target bundleno = 256 (0x100), region = 28  ;;  %p170_p3 = scmp.lt.s32.totalorder (!%p142_p2), %s537_s18, 63 }
   0xb   : > { %v202_v0 = vld [vmem:[%s787_s1 + $0x8] sm:$0xff]  ;;  %v201_v1 = vld [vmem:[%s787_s1] sm:$0xff]  ;;  %s791_s18 = smov (!%p170_p3, %s537_s18), 63  ;;  %vm203_vm0 = vcmask 130048   ;;  %vm317_vm1 = vcmask 64512   ;;  %s793_s13 = smov (!%p181_p4, %s608_s13), 3 }
   0xc   : > { %266 = vmatpush.msra.mxu0 %v202_v0  ;;  %560 = vmatpush.msra.mxu1 %v202_v0  ;;  %s538_s19 = sshll.u32 %s791_s18, 3  ;;  %s541_s26 = sshll.u32 %s793_s13, 1  ;;  %vm441_vm2 = vcmask 1040384   ;;  %vm443_vm3 = vcmask 58368  }
   0xd   : > { %561 = vmatpush.msra.mxu2 %v202_v0  ;;  %562 = vmatpush.msra.mxu3 %v202_v0  ;;  %s173_s22 = scalar_lea.vmem %s786_s0, %s538_s19  ;;  %s648_s25 = scalar_lea.vmem %s788_s2, %s538_s19 }
   0xe   : > { %267 = vmatpush.msra.mxu0 %v201_v1  ;;  %563 = vmatpush.msra.mxu1 %v201_v1  ;;  %v185_v2 = vld [vmem:[%s173_s22] sm:$0xff]  ;;  %v186_v6 = vld [vmem:[%s173_s22 + $0x8] sm:$0xff]  ;;  %v187_v10 = vld [vmem:[%s173_s22 + $0x10] sm:$0xff]  ;;  %s184_s29 = scalar_lea.vmem %s789_s3, %s541_s26 }
   0xf   : > { %564 = vmatpush.msra.mxu2 %v201_v1  ;;  %565 = vmatpush.msra.mxu3 %v201_v1  ;;  %v189_v3 = vld [vmem:[%s173_s22 + $0x20] sm:$0xff]  ;;  %v190_v7 = vld [vmem:[%s173_s22 + $0x28] sm:$0xff]  ;;  %v191_v11 = vld [vmem:[%s173_s22 + $0x30] sm:$0xff] }
  0x10   : > { %542 = vmatmul.msk.f32.vlgmr.msra.gmra.mxu0 %vm203_vm0, %v185_v2  ;;  %546 = vmatmul.msk.f32.vlgmr.msra.gmra.mxu1 %vm203_vm0, %v189_v3  ;;  %v193_v4 = vld [vmem:[%s173_s22 + $0x40] sm:$0xff]  ;;  %v194_v8 = vld [vmem:[%s173_s22 + $0x48] sm:$0xff]  ;;  %v195_v12 = vld [vmem:[%s173_s22 + $0x50] sm:$0xff] }
  0x11   : > { %550 = vmatmul.msk.f32.vlgmr.msra.gmra.mxu2 %vm203_vm0, %v193_v4  ;;  %v197_v5 = vld [vmem:[%s173_s22 + $0x60] sm:$0xff]  ;;  %v198_v9 = vld [vmem:[%s173_s22 + $0x68] sm:$0xff]  ;;  %v199_v13 = vld [vmem:[%s173_s22 + $0x70] sm:$0xff] }
  0x12   : > { %554 = vmatmul.msk.f32.vlgmr.msra.gmra.mxu3 %vm203_vm0, %v197_v5  ;;  %v188_v14 = vld [vmem:[%s173_s22 + $0x18] sm:$0xff] }
  0x13   : > { %v192_v15 = vld [vmem:[%s173_s22 + $0x38] sm:$0xff] }
  0x14   : > { %v196_v16 = vld [vmem:[%s173_s22 + $0x58] sm:$0xff] }
  0x15   : > { %v200_v17 = vld [vmem:[%s173_s22 + $0x78] sm:$0xff] }
  0x18   : > { %543 = vmatmul.msk.f32.gmra.mxu0 %vm203_vm0, %v186_v6  ;;  %547 = vmatmul.msk.f32.gmra.mxu1 %vm203_vm0, %v190_v7 }
  0x19   : > { %551 = vmatmul.msk.f32.gmra.mxu2 %vm203_vm0, %v194_v8 }
  0x1a   : > { %555 = vmatmul.msk.f32.gmra.mxu3 %vm203_vm0, %v198_v9 }
  0x20   : > { %544 = vmatmul.msk.f32.gmra.mxu0 %vm203_vm0, %v187_v10  ;;  %548 = vmatmul.msk.f32.gmra.mxu1 %vm203_vm0, %v191_v11 }
  0x21   : > { %552 = vmatmul.msk.f32.gmra.mxu2 %vm203_vm0, %v195_v12 }
  0x22   : > { %556 = vmatmul.msk.f32.gmra.mxu3 %vm203_vm0, %v199_v13 }
  0x28   : > { %545 = vmatmul.msk.f32.gmra.mxu0 %vm203_vm0, %v188_v14  ;;  %549 = vmatmul.msk.f32.gmra.mxu1 %vm203_vm0, %v192_v15 }
  0x29   : > { %553 = vmatmul.msk.f32.gmra.mxu2 %vm203_vm0, %v196_v16 }
  0x2a   : > { %557 = vmatmul.msk.f32.gmra.mxu3 %vm203_vm0, %v200_v17 }
  0x8d   : > { %v650_v18 = vpop.f32.mrf.mxu0  ;;  %v652_v19 = vpop.f32.mrf.mxu1 }
  0x8e   : > { %318 = vst.msk [vmem:[%s648_s25] sm:$0xff] %vm317_vm1, %v650_v18  ;;  %v334_v29 = vsel %vm317_vm1, %v650_v18, 0.0  ;;  %v341_v39 = vsel %vm317_vm1, %v652_v19, 0.0 }
  0x8f   : > { %322 = vst.msk [vmem:[%s648_s25 + $0x20] sm:$0xff] %vm317_vm1, %v652_v19 }
  0x94   : > { %v660_v20 = vpop.f32.mrf.mxu2 }
  0x95   : > { %v662_v21 = vpop.f32.mrf.mxu0  ;;  %v664_v22 = vpop.f32.mrf.mxu1  ;;  %326 = vst.msk [vmem:[%s648_s25 + $0x40] sm:$0xff] %vm317_vm1, %v660_v20  ;;  %v349_v49 = vsel %vm317_vm1, %v660_v20, 0.0 }
  0x96   : > { %319 = vst.msk [vmem:[%s648_s25 + $0x8] sm:$0xff] %vm317_vm1, %v662_v21  ;;  %v672_v23 = vpop.f32.mrf.mxu3  ;;  %v335_v28 = vsel %vm317_vm1, %v662_v21, 0.0  ;;  %v343_v41 = vsel %vm317_vm1, %v664_v22, 0.0 }
  0x97   : > { %323 = vst.msk [vmem:[%s648_s25 + $0x28] sm:$0xff] %vm317_vm1, %v664_v22  ;;  %v336_v31 = vadd.f32 %v335_v28, %v334_v29  ;;  %v357_v57 = vsel %vm317_vm1, %v672_v23, 0.0 }
  0x98   : > { %330 = vst.msk [vmem:[%s648_s25 + $0x60] sm:$0xff] %vm317_vm1, %v672_v23 }
  0x9c   : > { %v680_v24 = vpop.f32.mrf.mxu2 }
  0x9d   : > { %v275_v25 = vpop.f32.mrf.mxu0  ;;  %v682_v26 = vpop.f32.mrf.mxu1  ;;  %327 = vst.msk [vmem:[%s648_s25 + $0x48] sm:$0xff] %vm317_vm1, %v680_v24  ;;  %v351_v51 = vsel %vm317_vm1, %v680_v24, 0.0 }
  0x9e   : > { %320 = vst.msk [vmem:[%s648_s25 + $0x10] sm:$0xff] %vm317_vm1, %v275_v25  ;;  %v689_v27 = vpop.f32.mrf.mxu3  ;;  %v337_v30 = vsel %vm317_vm1, %v275_v25, 0.0  ;;  %v345_v43 = vsel %vm317_vm1, %v682_v26, 0.0 }
  0x9f   : > { %324 = vst.msk [vmem:[%s648_s25 + $0x30] sm:$0xff] %vm317_vm1, %v682_v26  ;;  %v338_v33 = vadd.f32 %v337_v30, %v336_v31  ;;  %v359_v59 = vsel %vm317_vm1, %v689_v27, 0.0 }
  0xa0   : > { %331 = vst.msk [vmem:[%s648_s25 + $0x68] sm:$0xff] %vm317_vm1, %v689_v27 }
  0xa4   : > { %v702_v32 = vpop.f32.mrf.mxu2 }
  0xa5   : > { %v278_v34 = vpop.f32.mrf.mxu0  ;;  %v290_v35 = vpop.f32.mrf.mxu1  ;;  %328 = vst.msk [vmem:[%s648_s25 + $0x50] sm:$0xff] %vm317_vm1, %v702_v32  ;;  %v353_v53 = vsel %vm317_vm1, %v702_v32, 0.0 }
  0xa6   : > { %321 = vst.msk [vmem:[%s648_s25 + $0x18] sm:$0xff] %vm317_vm1, %v278_v34  ;;  %v339_v36 = vsel %vm317_vm1, %v278_v34, 0.0  ;;  %v710_v37 = vpop.f32.mrf.mxu3  ;;  %v347_v44 = vsel %vm317_vm1, %v290_v35, 0.0 }
  0xa7   : > { %v340_v38 = vadd.f32 %v339_v36, %v338_v33  ;;  %325 = vst.msk [vmem:[%s648_s25 + $0x38] sm:$0xff] %vm317_vm1, %v290_v35  ;;  %v361_v61 = vsel %vm317_vm1, %v710_v37, 0.0 }
  0xa8   : > { %332 = vst.msk [vmem:[%s648_s25 + $0x70] sm:$0xff] %vm317_vm1, %v710_v37 }
  0xa9   : > { %v342_v40 = vadd.f32 %v341_v39, %v340_v38 }
  0xab   : > { %v344_v42 = vadd.f32 %v343_v41, %v342_v40 }
  0xac   : > { %v302_v45 = vpop.f32.mrf.mxu2 }
  0xad   : > { %v346_v46 = vadd.f32 %v345_v43, %v344_v42  ;;  %329 = vst.msk [vmem:[%s648_s25 + $0x58] sm:$0xff] %vm317_vm1, %v302_v45  ;;  %v355_v54 = vsel %vm317_vm1, %v302_v45, 0.0 }
  0xae   : > { %v726_v47 = vpop.f32.mrf.mxu3 }
  0xaf   : > { %v348_v48 = vadd.f32 %v347_v44, %v346_v46  ;;  %333 = vst.msk [vmem:[%s648_s25 + $0x78] sm:$0xff] %vm317_vm1, %v726_v47  ;;  %v363_v62 = vsel %vm317_vm1, %v726_v47, 0.0 }
  0xb1   : > { %v350_v50 = vadd.f32 %v349_v49, %v348_v48 }
  0xb3   : > { %v352_v52 = vadd.f32 %v351_v51, %v350_v50 }
  0xb5   : > { %v354_v55 = vadd.f32 %v353_v53, %v352_v52 }
  0xb7   : > { %v356_v56 = vadd.f32 %v355_v54, %v354_v55 }
  0xb9   : > { %v358_v58 = vadd.f32 %v357_v57, %v356_v56 }
  0xbb   : > { %v360_v60 = vadd.f32 %v359_v59, %v358_v58 }
  0xbd   : > { %v362_v63 = vadd.f32 %v361_v61, %v360_v60 }
  0xbf   : > { %v364_v0 = vadd.f32 %v363_v62, %v362_v63 }
  0xc1   : > { %v365_v1 = vrot.slane %v364_v0, 4 }
  0xc3   : > { %v366_v2 = vadd.f32 %v365_v1, %v364_v0 }
  0xc5   : > { %v367_v3 = vrot.slane %v366_v2, 2 }
  0xc7   : > { %v368_v4 = vadd.f32 %v367_v3, %v366_v2 }
  0xc9   : > { %v369_v5 = vrot.slane %v368_v4, 1 }
  0xcb   : > { %v746_v6 = vadd.f32 %v369_v5, %v368_v4 }
  0xcd   : > { %v371_v7 = vmul.f32 0.0078125, %v746_v6 }
  0xcf   : > { %v372_v8 = vsub.f32 %v650_v18, %v371_v7  ;;  %v373_v9 = vsub.f32 %v662_v21, %v371_v7  ;;  %v374_v10 = vsub.f32 %v275_v25, %v371_v7  ;;  %v375_v11 = vsub.f32 %v278_v34, %v371_v7 }
  0xd0   : > { %v376_v14 = vsub.f32 %v652_v19, %v371_v7  ;;  %v377_v16 = vsub.f32 %v664_v22, %v371_v7  ;;  %v378_v31 = vsub.f32 %v682_v26, %v371_v7  ;;  %v379_v33 = vsub.f32 %v290_v35, %v371_v7 }
  0xd1   : > { %v388_v12 = vmul.f32 %v372_v8, %v372_v8  ;;  %v389_v13 = vmul.f32 %v373_v9, %v373_v9  ;;  %v390_v15 = vmul.f32 %v374_v10, %v374_v10  ;;  %v391_v17 = vmul.f32 %v375_v11, %v375_v11 }
  0xd2   : > { %v392_v18 = vmul.f32 %v376_v14, %v376_v14  ;;  %v393_v34 = vmul.f32 %v377_v16, %v377_v16  ;;  %v380_v38 = vsub.f32 %v660_v20, %v371_v7  ;;  %v394_v22 = vmul.f32 %v378_v31, %v378_v31 }
  0xd3   : > { %v404_v28 = vsel %vm317_vm1, %v388_v12, 0.0  ;;  %v405_v29 = vsel %vm317_vm1, %v389_v13, 0.0  ;;  %v407_v21 = vsel %vm317_vm1, %v390_v15, 0.0  ;;  %v409_v36 = vsel %vm317_vm1, %v391_v17, 0.0 }
  0xd4   : > { %v406_v30 = vadd.f32 %v405_v29, %v404_v28  ;;  %v411_v39 = vsel %vm317_vm1, %v392_v18, 0.0  ;;  %v381_v41 = vsub.f32 %v680_v24, %v371_v7  ;;  %v395_v42 = vmul.f32 %v379_v33, %v379_v33 }
  0xd5   : > { %v413_v26 = vsel %vm317_vm1, %v393_v34, 0.0  ;;  %v382_v44 = vsub.f32 %v702_v32, %v371_v7  ;;  %v396_v46 = vmul.f32 %v380_v38, %v380_v38  ;;  %v415_v35 = vsel %vm317_vm1, %v394_v22, 0.0 }
  0xd6   : > { %v408_v25 = vadd.f32 %v407_v21, %v406_v30  ;;  %v383_v49 = vsub.f32 %v302_v45, %v371_v7  ;;  %v397_v50 = vmul.f32 %v381_v41, %v381_v41  ;;  %v417_v20 = vsel %vm317_vm1, %v395_v42, 0.0 }
  0xd7   : > { %v384_v52 = vsub.f32 %v672_v23, %v371_v7  ;;  %v398_v53 = vmul.f32 %v382_v44, %v382_v44  ;;  %v419_v24 = vsel %vm317_vm1, %v396_v46, 0.0  ;;  %v385_v55 = vsub.f32 %v689_v27, %v371_v7 }
  0xd8   : > { %v410_v19 = vadd.f32 %v409_v36, %v408_v25  ;;  %v399_v56 = vmul.f32 %v383_v49, %v383_v49  ;;  %v421_v32 = vsel %vm317_vm1, %v397_v50, 0.0  ;;  %v386_v58 = vsub.f32 %v710_v37, %v371_v7 }
  0xd9   : > { %v400_v59 = vmul.f32 %v384_v52, %v384_v52  ;;  %v423_v45 = vsel %vm317_vm1, %v398_v53, 0.0  ;;  %v387_v61 = vsub.f32 %v726_v47, %v371_v7  ;;  %v401_v23 = vmul.f32 %v385_v55, %v385_v55 }
  0xda   : > { %v412_v40 = vadd.f32 %v411_v39, %v410_v19  ;;  %v425_v62 = vsel %vm317_vm1, %v399_v56, 0.0  ;;  %v402_v0 = vmul.f32 %v386_v58, %v386_v58 }
  0xdb   : > { %v427_v27 = vsel %vm317_vm1, %v400_v59, 0.0  ;;  %v403_v2 = vmul.f32 %v387_v61, %v387_v61  ;;  %v429_v3 = vsel %vm317_vm1, %v401_v23, 0.0 }
  0xdc   : > { %v414_v43 = vadd.f32 %v413_v26, %v412_v40  ;;  %v431_v4 = vsel %vm317_vm1, %v402_v0, 0.0 }
  0xdd   : > { %v433_v8 = vsel %vm317_vm1, %v403_v2, 0.0 }
  0xde   : > { %v416_v48 = vadd.f32 %v415_v35, %v414_v43 }
  0xe0   : > { %v418_v51 = vadd.f32 %v417_v20, %v416_v48 }
  0xe2   : > { %v420_v54 = vadd.f32 %v419_v24, %v418_v51 }
  0xe4   : > { %v422_v57 = vadd.f32 %v421_v32, %v420_v54 }
  0xe6   : > { %v424_v60 = vadd.f32 %v423_v45, %v422_v57 }
  0xe8   : > { %v426_v63 = vadd.f32 %v425_v62, %v424_v60 }
  0xea   : > { %v428_v1 = vadd.f32 %v427_v27, %v426_v63 }
  0xec   : > { %v430_v37 = vadd.f32 %v429_v3, %v428_v1 }
  0xee   : > { %v432_v5 = vadd.f32 %v431_v4, %v430_v37 }
  0xf0   : > { %v434_v9 = vadd.f32 %v433_v8, %v432_v5 }
  0xf2   : > { %v435_v47 = vrot.slane %v434_v9, 4 }
  0xf4   : > { %v436_v7 = vadd.f32 %v435_v47, %v434_v9 }
  0xf6   : > { %v437_v10 = vrot.slane %v436_v7, 2 }
  0xf8   : > { %v438_v11 = vadd.f32 %v437_v10, %v436_v7 }
  0xfa   : > { %v439_v12 = vrot.slane %v438_v11, 1 }
  0xfc   : > { %v440_v13 = vadd.f32 %v439_v12, %v438_v11 }
  0xfe   : > { %v442_v14 = vsel %vm441_vm2, %v746_v6, %v440_v13 }
  0xff   : > { %444 = vst.msk [vmem:[%s184_s29] sm:$0x3] %vm443_vm3, %v442_v14 }
 0x100 PF: > { %s14_s12 = sadd.s32 1, %s580_s12  }
 0x101   : > { %p11_p5 = scmp.ge.s32.totalorder %s14_s12, 6  }
 0x103   :  { %13 = sbr.rel (!%p11_p5) target bundleno = 1 (0x1), region = 70 }

// kernel: residual_block_forward.9
= control target key start
LH: loop header
LB: loop body
LE: loop exit
PB: predicated region body
PF: predicated region fallthrough
CT: control target
= control target key end

     0   :  { %s500_s15 = smov 0   ;;  %s639_s0 = inlined_call_operand.vmem [shape: f32[512,16], index: 0, kind: input, shape index: {}]   ;;  %s640_s1 = inlined_call_operand.vmem [shape: f32[1,16], index: 1, kind: input, shape index: {}]   ;;  %s641_s2 = inlined_call_operand.vmem [shape: f32[1,16], index: 2, kind: input, shape index: {}]   ;;  %s642_s3 = inlined_call_operand.vmem [shape: f32[512,16], index: 3, kind: input, shape index: {}]   ;;  %s643_s4 = inlined_call_operand.vmem [shape: f32[512,16], index: 4, kind: output, shape index: {}]  }
   0x1 LB: > { %s444_s16 = sadd.s32 4294967295, %s473_s15   ;;  %p448_p0 = scmp.ge.s32.totalorder %s473_s15, 1  ;;  %s473_s15 = sphi %s500_s15, %s14_s15  }
   0x2   : > { %p174_p1 = scmp.lt.s32.totalorder %s473_s15, 5 }
   0x4   : > { %p175_p2 = pnand %p448_p0, %p174_p1 }
   0x5   : > { %s449_s17 = sshll.u32 (!%p175_p2), %s444_s16, 4 }
   0x6   : > { %178 = sbr.rel (%p175_p2) target bundleno = 45 (0x2d), region = 36  ;;  %p206_p3 = scmp.lt.s32.totalorder (!%p175_p2), %s449_s17, 63 }
   0xb   : > { %s645_s17 = smov (!%p206_p3, %s449_s17), 63  ;;  %v511_v0 = vld [vmem:[%s640_s1] ss:$0 sm:$0xff]  ;;  %vm359_vm0 = vcmask 130048  }
   0xc   : > { %s513_s20 = sshll.u32 %s645_s17, 3  ;;  %v524_v1 = vld [vmem:[%s641_s2] ss:$0 sm:$0xff] }
   0xd   : > { %s519_s23 = scalar_lea.vmem %s639_s0, %s513_s20  ;;  %s532_s28 = scalar_lea.vmem %s642_s3, %s513_s20 }
   0xe   : > { %v223_v2 = vld [vmem:[%s519_s23] sm:$0xff]  ;;  %v224_v3 = vld [vmem:[%s519_s23 + $0x8] sm:$0xff]  ;;  %v225_v6 = vld [vmem:[%s519_s23 + $0x10] sm:$0xff]  ;;  %s557_s5 = scalar_lea.vmem %s643_s4, %s513_s20 }
   0xf   : > { %v243_v4 = vmul.f32 %v511_v0, %v223_v2  ;;  %v244_v5 = vmul.f32 %v511_v0, %v224_v3  ;;  %v245_v7 = vmul.f32 %v511_v0, %v225_v6  ;;  %v226_v8 = vld [vmem:[%s519_s23 + $0x18] sm:$0xff]  ;;  %v227_v9 = vld [vmem:[%s519_s23 + $0x20] sm:$0xff]  ;;  %v228_v14 = vld [vmem:[%s519_s23 + $0x28] sm:$0xff] }
  0x10   : > { %v246_v12 = vmul.f32 %v511_v0, %v226_v8  ;;  %v247_v13 = vmul.f32 %v511_v0, %v227_v9  ;;  %v327_v15 = vld [vmem:[%s532_s28] sm:$0xff]  ;;  %v328_v16 = vld [vmem:[%s532_s28 + $0x8] sm:$0xff]  ;;  %v248_v18 = vmul.f32 %v511_v0, %v228_v14  ;;  %v229_v19 = vld [vmem:[%s519_s23 + $0x30] sm:$0xff] }
  0x11   : > { %v263_v10 = vadd.f32 %v524_v1, %v243_v4  ;;  %v264_v11 = vadd.f32 %v524_v1, %v244_v5  ;;  %v265_v17 = vadd.f32 %v524_v1, %v245_v7  ;;  %v329_v23 = vld [vmem:[%s532_s28 + $0x10] sm:$0xff]  ;;  %v249_v29 = vmul.f32 %v511_v0, %v229_v19  ;;  %v230_v30 = vld [vmem:[%s519_s23 + $0x38] sm:$0xff]  ;;  %v231_v35 = vld [vmem:[%s519_s23 + $0x40] sm:$0xff] }
  0x12   : > { %v266_v24 = vadd.f32 %v524_v1, %v246_v12  ;;  %v267_v25 = vadd.f32 %v524_v1, %v247_v13  ;;  %v268_v28 = vadd.f32 %v524_v1, %v248_v18  ;;  %v330_v34 = vld [vmem:[%s532_s28 + $0x18] sm:$0xff]  ;;  %v232_v36 = vld [vmem:[%s519_s23 + $0x48] sm:$0xff]  ;;  %v331_v40 = vld [vmem:[%s532_s28 + $0x20] sm:$0xff]  ;;  %v250_v44 = vmul.f32 %v511_v0, %v230_v30 }
  0x13   : > { %vm279_vm1 = vcmp.gt.f32.partialorder %v263_v10, 0.0  ;;  %v295_v20 = vmul.f32 0.1, %v263_v10  ;;  %vm280_vm2 = vcmp.gt.f32.partialorder %v264_v11, 0.0  ;;  %v296_v21 = vmul.f32 0.1, %v264_v11 }
  0x14   : > { %vm281_vm3 = vcmp.gt.f32.partialorder %v265_v17, 0.0  ;;  %v297_v22 = vmul.f32 0.1, %v265_v17  ;;  %vm282_vm4 = vcmp.gt.f32.partialorder %v266_v24, 0.0  ;;  %v298_v38 = vmul.f32 0.1, %v266_v24 }
  0x15   : > { %v311_v26 = vsel %vm279_vm1, %v263_v10, %v295_v20  ;;  %v312_v27 = vsel %vm280_vm2, %v264_v11, %v296_v21  ;;  %vm283_vm5 = vcmp.gt.f32.partialorder %v267_v25, 0.0  ;;  %v299_v39 = vmul.f32 0.1, %v267_v25  ;;  %v332_v42 = vld [vmem:[%s532_s28 + $0x28] sm:$0xff]  ;;  %v233_v49 = vld [vmem:[%s519_s23 + $0x50] sm:$0xff]  ;;  %v234_v50 = vld [vmem:[%s519_s23 + $0x58] sm:$0xff] }
  0x16   : > { %v343_v31 = vadd.f32 %v327_v15, %v311_v26  ;;  %v344_v32 = vadd.f32 %v328_v16, %v312_v27  ;;  %v313_v33 = vsel %vm281_vm3, %v265_v17, %v297_v22  ;;  %vm284_vm6 = vcmp.gt.f32.partialorder %v268_v28, 0.0  ;;  %v235_v51 = vld [vmem:[%s519_s23 + $0x60] sm:$0xff]  ;;  %v333_v57 = vld [vmem:[%s532_s28 + $0x30] sm:$0xff]  ;;  %v334_v60 = vld [vmem:[%s532_s28 + $0x38] sm:$0xff] }
  0x17   : > { %v345_v37 = vadd.f32 %v329_v23, %v313_v33  ;;  %v300_v41 = vmul.f32 0.1, %v268_v28  ;;  %v269_v43 = vadd.f32 %v524_v1, %v249_v29  ;;  %v314_v45 = vsel %vm282_vm4, %v266_v24, %v298_v38  ;;  %v335_v61 = vld [vmem:[%s532_s28 + $0x40] sm:$0xff]  ;;  %v336_v63 = vld [vmem:[%s532_s28 + $0x48] sm:$0xff]  ;;  %v237_v19 = vld [vmem:[%s519_s23 + $0x70] sm:$0xff] }
  0x18   : > { %360 = vst.msk [vmem:[%s557_s5] sm:$0xff] %vm359_vm0, %v343_v31  ;;  %v315_v46 = vsel %vm283_vm5, %v267_v25, %v299_v39  ;;  %v251_v47 = vmul.f32 %v511_v0, %v231_v35  ;;  %v252_v48 = vmul.f32 %v511_v0, %v232_v36  ;;  %v346_v52 = vadd.f32 %v330_v34, %v314_v45  ;;  %v236_v7 = vld [vmem:[%s519_s23 + $0x68] sm:$0xff]  ;;  %v238_v20 = vld [vmem:[%s519_s23 + $0x78] sm:$0xff]  ;;  %v337_v24 = vld [vmem:[%s532_s28 + $0x50] sm:$0xff] }
  0x19   : > { %361 = vst.msk [vmem:[%s557_s5 + $0x8] sm:$0xff] %vm359_vm0, %v344_v32  ;;  %v347_v53 = vadd.f32 %v331_v40, %v315_v46  ;;  %v316_v54 = vsel %vm284_vm6, %v268_v28, %v300_v41  ;;  %vm285_vm7 = vcmp.gt.f32.partialorder %v269_v43, 0.0  ;;  %v301_v56 = vmul.f32 0.1, %v269_v43  ;;  %v338_v26 = vld [vmem:[%s532_s28 + $0x58] sm:$0xff]  ;;  %v339_v30 = vld [vmem:[%s532_s28 + $0x60] sm:$0xff] }
  0x1a   : > { %362 = vst.msk [vmem:[%s557_s5 + $0x10] sm:$0xff] %vm359_vm0, %v345_v37  ;;  %v348_v55 = vadd.f32 %v332_v42, %v316_v54  ;;  %v270_v58 = vadd.f32 %v524_v1, %v250_v44  ;;  %v271_v59 = vadd.f32 %v524_v1, %v251_v47  ;;  %v272_v62 = vadd.f32 %v524_v1, %v252_v48  ;;  %v340_v36 = vld [vmem:[%s532_s28 + $0x68] sm:$0xff]  ;;  %v341_v44 = vld [vmem:[%s532_s28 + $0x70] sm:$0xff]  ;;  %v342_v46 = vld [vmem:[%s532_s28 + $0x78] sm:$0xff] }
  0x1b   : > { %363 = vst.msk [vmem:[%s557_s5 + $0x18] sm:$0xff] %vm359_vm0, %v346_v52  ;;  %v253_v2 = vmul.f32 %v511_v0, %v233_v49  ;;  %v254_v3 = vmul.f32 %v511_v0, %v234_v50  ;;  %v255_v4 = vmul.f32 %v511_v0, %v235_v51  ;;  %v317_v5 = vsel %vm285_vm7, %v269_v43, %v301_v56 }
  0x1c   : > { %364 = vst.msk [vmem:[%s557_s5 + $0x20] sm:$0xff] %vm359_vm0, %v347_v53  ;;  %vm286_vm8 = vcmp.gt.f32.partialorder %v270_v58, 0.0  ;;  %v302_v6 = vmul.f32 0.1, %v270_v58  ;;  %vm287_vm9 = vcmp.gt.f32.partialorder %v271_v59, 0.0  ;;  %v349_v8 = vadd.f32 %v333_v57, %v317_v5 }
  0x1d   : > { %365 = vst.msk [vmem:[%s557_s5 + $0x28] sm:$0xff] %vm359_vm0, %v348_v55  ;;  %v303_v9 = vmul.f32 0.1, %v271_v59  ;;  %vm288_vm10 = vcmp.gt.f32.partialorder %v272_v62, 0.0  ;;  %v304_v10 = vmul.f32 0.1, %v272_v62  ;;  %v273_v12 = vadd.f32 %v524_v1, %v253_v2 }
  0x1e   : > { %v318_v11 = vsel %vm286_vm8, %v270_v58, %v302_v6  ;;  %v274_v13 = vadd.f32 %v524_v1, %v254_v3  ;;  %v275_v14 = vadd.f32 %v524_v1, %v255_v4  ;;  %366 = vst.msk [vmem:[%s557_s5 + $0x30] sm:$0xff] %vm359_vm0, %v349_v8  ;;  %v256_v18 = vmul.f32 %v511_v0, %v236_v7 }
  0x1f   : > { %v350_v15 = vadd.f32 %v334_v60, %v318_v11  ;;  %v319_v16 = vsel %vm287_vm9, %v271_v59, %v303_v9  ;;  %v320_v17 = vsel %vm288_vm10, %v272_v62, %v304_v10  ;;  %vm289_vm11 = vcmp.gt.f32.partialorder %v273_v12, 0.0 }
  0x20   : > { %v351_v21 = vadd.f32 %v335_v61, %v319_v16  ;;  %v352_v22 = vadd.f32 %v336_v63, %v320_v17  ;;  %v305_v23 = vmul.f32 0.1, %v273_v12  ;;  %vm290_vm12 = vcmp.gt.f32.partialorder %v274_v13, 0.0 }
  0x21   : > { %367 = vst.msk [vmem:[%s557_s5 + $0x38] sm:$0xff] %vm359_vm0, %v350_v15  ;;  %v306_v25 = vmul.f32 0.1, %v274_v13  ;;  %vm291_vm13 = vcmp.gt.f32.partialorder %v275_v14, 0.0  ;;  %v276_v27 = vadd.f32 %v524_v1, %v256_v18  ;;  %v307_v29 = vmul.f32 0.1, %v275_v14 }
  0x22   : > { %368 = vst.msk [vmem:[%s557_s5 + $0x40] sm:$0xff] %vm359_vm0, %v351_v21  ;;  %v321_v28 = vsel %vm289_vm11, %v273_v12, %v305_v23  ;;  %v257_v31 = vmul.f32 %v511_v0, %v237_v19  ;;  %v258_v32 = vmul.f32 %v511_v0, %v238_v20 }
  0x23   : > { %369 = vst.msk [vmem:[%s557_s5 + $0x48] sm:$0xff] %vm359_vm0, %v352_v22  ;;  %v353_v33 = vadd.f32 %v337_v24, %v321_v28  ;;  %v322_v34 = vsel %vm290_vm12, %v274_v13, %v306_v25  ;;  %vm292_vm14 = vcmp.gt.f32.partialorder %v276_v27, 0.0  ;;  %v308_v35 = vmul.f32 0.1, %v276_v27 }
  0x24   : > { %v354_v37 = vadd.f32 %v338_v26, %v322_v34  ;;  %v323_v38 = vsel %vm291_vm13, %v275_v14, %v307_v29  ;;  %v277_v39 = vadd.f32 %v524_v1, %v257_v31  ;;  %v278_v40 = vadd.f32 %v524_v1, %v258_v32 }
  0x25   : > { %370 = vst.msk [vmem:[%s557_s5 + $0x50] sm:$0xff] %vm359_vm0, %v353_v33  ;;  %v355_v0 = vadd.f32 %v339_v30, %v323_v38  ;;  %v324_v41 = vsel %vm292_vm14, %v276_v27, %v308_v35 }
  0x26   : > { %371 = vst.msk [vmem:[%s557_s5 + $0x58] sm:$0xff] %vm359_vm0, %v354_v37  ;;  %v356_v42 = vadd.f32 %v340_v36, %v324_v41  ;;  %vm293_vm15 = vcmp.gt.f32.partialorder %v277_v39, 0.0  ;;  %v309_v43 = vmul.f32 0.1, %v277_v39  ;;  %vm294_vm1 = vcmp.gt.f32.partialorder %v278_v40, 0.0 }
  0x27   : > { %372 = vst.msk [vmem:[%s557_s5 + $0x60] sm:$0xff] %vm359_vm0, %v355_v0  ;;  %v310_v45 = vmul.f32 0.1, %v278_v40 }
  0x28   : > { %373 = vst.msk [vmem:[%s557_s5 + $0x68] sm:$0xff] %vm359_vm0, %v356_v42  ;;  %v325_v1 = vsel %vm293_vm15, %v277_v39, %v309_v43 }
  0x29   : > { %v357_v47 = vadd.f32 %v341_v44, %v325_v1  ;;  %v326_v48 = vsel %vm294_vm1, %v278_v40, %v310_v45 }
  0x2a   : > { %v358_v49 = vadd.f32 %v342_v46, %v326_v48 }
  0x2b   : > { %374 = vst.msk [vmem:[%s557_s5 + $0x70] sm:$0xff] %vm359_vm0, %v357_v47 }
  0x2c   : > { %375 = vst.msk [vmem:[%s557_s5 + $0x78] sm:$0xff] %vm359_vm0, %v358_v49 }
  0x2d PF: > { %s14_s15 = sadd.s32 1, %s473_s15  }
  0x2e   : > { %p11_p4 = scmp.ge.s32.totalorder %s14_s15, 6  }
  0x30   :  { %13 = sbr.rel (!%p11_p4) target bundleno = 1 (0x1), region = 69 }

// kernel: residual_block_forward.7
= control target key start
LH: loop header
LB: loop body
LE: loop exit
PB: predicated region body
PF: predicated region fallthrough
CT: control target
= control target key end

     0   :  { %s953_s24 = smov 0   ;;  %s1260_s0 = inlined_call_operand.vmem [shape: f32[512,16], index: 0, kind: input, shape index: {}]   ;;  %s1261_s1 = inlined_call_operand.vmem [shape: f32[1,16], index: 1, kind: input, shape index: {}]   ;;  %s1262_s2 = inlined_call_operand.vmem [shape: f32[1,16], index: 2, kind: input, shape index: {}]   ;;  %s1263_s3 = inlined_call_operand.vmem [shape: f32[512,16], index: 3, kind: input, shape index: {}]   ;;  %s1264_s4 = inlined_call_operand.vmem [shape: f32[16,8], index: 4, kind: input, shape index: {}]   ;;  %s1265_s5 = inlined_call_operand.vmem [shape: f32[512,16], index: 5, kind: output, shape index: {0}]   ;;  %s1266_s6 = inlined_call_operand.vmem [shape: f32[512,8], index: 6, kind: output, shape index: {1}]   ;;  %s1267_s7 = inlined_call_operand.vmem [shape: f32[4,2,8], index: 7, kind: output, shape index: {2}]  }
   0x1 LB: > { %s959_s25 = sadd.s32 4294967295, %s911_s24   ;;  %p861_p0 = scmp.ge.s32.totalorder %s911_s24, 1  ;;  %s911_s24 = sphi %s953_s24, %s18_s24  }
   0x2   : > { %p254_p1 = scmp.lt.s32.totalorder %s911_s24, 5 }
   0x4   : > { %p255_p2 = pnand %p861_p0, %p254_p1 }
   0x5   : > { %s862_s30 = sshll.u32 (!%p255_p2), %s959_s25, 4  ;;  %p324_p4 = scmp.lt.s32.totalorder (!%p255_p2), %s959_s25, 3 }
   0x6   : > { %258 = sbr.rel (%p255_p2) target bundleno = 264 (0x108), region = 40  ;;  %p301_p3 = scmp.lt.s32.totalorder (!%p255_p2), %s862_s30, 63 }
   0xb   : > { %v482_v0 = vld [vmem:[%s1264_s4 + $0x8] sm:$0xff]  ;;  %v481_v1 = vld [vmem:[%s1264_s4] sm:$0xff]  ;;  %s1269_s30 = smov (!%p301_p3, %s862_s30), 63  ;;  %vm464_vm0 = vcmask 130048   ;;  %s1271_s25 = smov (!%p324_p4, %s959_s25), 3 }
   0xc   : > { %545 = vmatpush.msra.mxu0 %v482_v0  ;;  %889 = vmatpush.msra.mxu1 %v482_v0  ;;  %v973_v2 = vld [vmem:[%s1261_s1] ss:$0 sm:$0xff]  ;;  %s975_s10 = sshll.u32 %s1269_s30, 3  ;;  %s870_s27 = sshll.u32 %s1271_s25, 1 }
   0xd   : > { %890 = vmatpush.msra.mxu2 %v482_v0  ;;  %891 = vmatpush.msra.mxu3 %v482_v0  ;;  %s981_s13 = scalar_lea.vmem %s1260_s0, %s975_s10  ;;  %v986_v3 = vld [vmem:[%s1262_s2] ss:$0 sm:$0xff]  ;;  %s994_s18 = scalar_lea.vmem %s1263_s3, %s975_s10 }
   0xe   : > { %546 = vmatpush.msra.mxu0 %v481_v1  ;;  %892 = vmatpush.msra.mxu1 %v481_v1  ;;  %v328_v4 = vld [vmem:[%s981_s13] sm:$0xff]  ;;  %v329_v5 = vld [vmem:[%s981_s13 + $0x8] sm:$0xff]  ;;  %v330_v11 = vld [vmem:[%s981_s13 + $0x10] sm:$0xff]  ;;  %s1019_s21 = scalar_lea.vmem %s1265_s5, %s975_s10  ;;  %s1122_s26 = scalar_lea.vmem %s1266_s6, %s975_s10 }
   0xf   : > { %893 = vmatpush.msra.mxu2 %v481_v1  ;;  %894 = vmatpush.msra.mxu3 %v481_v1  ;;  %v348_v6 = vmul.f32 %v973_v2, %v328_v4  ;;  %v349_v7 = vmul.f32 %v973_v2, %v329_v5  ;;  %v332_v8 = vld [vmem:[%s981_s13 + $0x20] sm:$0xff]  ;;  %v350_v15 = vmul.f32 %v973_v2, %v330_v11  ;;  %v333_v16 = vld [vmem:[%s981_s13 + $0x28] sm:$0xff]  ;;  %v331_v37 = vld [vmem:[%s981_s13 + $0x18] sm:$0xff]  ;;  %s327_s30 = scalar_lea.vmem %s1267_s7, %s870_s27 }
  0x10   : > { %v352_v9 = vmul.f32 %v973_v2, %v332_v8  ;;  %v336_v10 = vld [vmem:[%s981_s13 + $0x40] sm:$0xff]  ;;  %v433_v18 = vld [vmem:[%s994_s18 + $0x8] sm:$0xff]  ;;  %v353_v20 = vmul.f32 %v973_v2, %v333_v16  ;;  %v434_v41 = vld [vmem:[%s994_s18 + $0x10] sm:$0xff]  ;;  %v351_v48 = vmul.f32 %v973_v2, %v331_v37 }
  0x11   : > { %v368_v12 = vadd.f32 %v986_v3, %v348_v6  ;;  %v369_v13 = vadd.f32 %v986_v3, %v349_v7  ;;  %v356_v14 = vmul.f32 %v973_v2, %v336_v10  ;;  %v432_v17 = vld [vmem:[%s994_s18] sm:$0xff]  ;;  %v337_v21 = vld [vmem:[%s981_s13 + $0x48] sm:$0xff]  ;;  %v370_v27 = vadd.f32 %v986_v3, %v350_v15  ;;  %v334_v49 = vld [vmem:[%s981_s13 + $0x30] sm:$0xff] }
  0x12   : > { %v372_v19 = vadd.f32 %v986_v3, %v352_v9  ;;  %v436_v25 = vld [vmem:[%s994_s18 + $0x20] sm:$0xff]  ;;  %v373_v30 = vadd.f32 %v986_v3, %v353_v20  ;;  %v357_v31 = vmul.f32 %v973_v2, %v337_v21  ;;  %v437_v43 = vld [vmem:[%s994_s18 + $0x28] sm:$0xff]  ;;  %v338_v50 = vld [vmem:[%s981_s13 + $0x50] sm:$0xff]  ;;  %v371_v59 = vadd.f32 %v986_v3, %v351_v48 }
  0x13   : > { %vm384_vm1 = vcmp.gt.f32.partialorder %v368_v12, 0.0  ;;  %v400_v22 = vmul.f32 0.1, %v368_v12  ;;  %vm385_vm2 = vcmp.gt.f32.partialorder %v369_v13, 0.0  ;;  %v401_v23 = vmul.f32 0.1, %v369_v13 }
  0x14   : > { %vm388_vm3 = vcmp.gt.f32.partialorder %v372_v19, 0.0  ;;  %v404_v24 = vmul.f32 0.1, %v372_v19  ;;  %v376_v26 = vadd.f32 %v986_v3, %v356_v14  ;;  %v340_v32 = vld [vmem:[%s981_s13 + $0x60] sm:$0xff]  ;;  %vm386_vm5 = vcmp.gt.f32.partialorder %v370_v27, 0.0  ;;  %v341_v51 = vld [vmem:[%s981_s13 + $0x68] sm:$0xff] }
  0x15   : > { %v416_v28 = vsel %vm384_vm1, %v368_v12, %v400_v22  ;;  %v417_v29 = vsel %vm385_vm2, %v369_v13, %v401_v23  ;;  %v440_v36 = vld [vmem:[%s994_s18 + $0x40] sm:$0xff]  ;;  %v402_v40 = vmul.f32 0.1, %v370_v27  ;;  %vm389_vm6 = vcmp.gt.f32.partialorder %v373_v30, 0.0  ;;  %v441_v57 = vld [vmem:[%s994_s18 + $0x48] sm:$0xff]  ;;  %v335_v63 = vld [vmem:[%s981_s13 + $0x38] sm:$0xff] }
  0x16   : > { %v448_v33 = vadd.f32 %v432_v17, %v416_v28  ;;  %v449_v34 = vadd.f32 %v433_v18, %v417_v29  ;;  %v420_v35 = vsel %vm388_vm3, %v372_v19, %v404_v24  ;;  %vm392_vm4 = vcmp.gt.f32.partialorder %v376_v26, 0.0  ;;  %v339_v0 = vld [vmem:[%s981_s13 + $0x58] sm:$0xff]  ;;  %v444_v5 = vld [vmem:[%s994_s18 + $0x60] sm:$0xff]  ;;  %v438_v12 = vld [vmem:[%s994_s18 + $0x30] sm:$0xff] }
  0x17   : > { %v452_v38 = vadd.f32 %v436_v25, %v420_v35  ;;  %v408_v39 = vmul.f32 0.1, %v376_v26  ;;  %v405_v42 = vmul.f32 0.1, %v373_v30  ;;  %v377_v44 = vadd.f32 %v986_v3, %v357_v31  ;;  %v435_v8 = vld [vmem:[%s994_s18 + $0x18] sm:$0xff]  ;;  %v342_v19 = vld [vmem:[%s981_s13 + $0x70] sm:$0xff] }
  0x18   : > { %465 = vst.msk [vmem:[%s1019_s21] sm:$0xff] %vm464_vm0, %v448_v33  ;;  %871 = vmatmul.msk.f32.vlgmr.msra.gmra.mxu0 %vm464_vm0, %v448_v33  ;;  %v360_v45 = vmul.f32 %v973_v2, %v340_v32  ;;  %v418_v47 = vsel %vm386_vm5, %v370_v27, %v402_v40  ;;  %v354_v60 = vmul.f32 %v973_v2, %v334_v49  ;;  %vm387_vm9 = vcmp.gt.f32.partialorder %v371_v59, 0.0  ;;  %v343_v20 = vld [vmem:[%s981_s13 + $0x78] sm:$0xff]  ;;  %v442_v23 = vld [vmem:[%s994_s18 + $0x50] sm:$0xff] }
  0x19   : > { %466 = vst.msk [vmem:[%s1019_s21 + $0x8] sm:$0xff] %vm464_vm0, %v449_v34  ;;  %875 = vmatmul.msk.f32.vlgmr.msra.gmra.mxu1 %vm464_vm0, %v452_v38  ;;  %v424_v46 = vsel %vm392_vm4, %v376_v26, %v408_v39  ;;  %v1043_v53 = vadd.f32 %v434_v41, %v418_v47  ;;  %v421_v54 = vsel %vm389_vm6, %v373_v30, %v405_v42  ;;  %vm393_vm7 = vcmp.gt.f32.partialorder %v377_v44, 0.0  ;;  %v445_v26 = vld [vmem:[%s994_s18 + $0x68] sm:$0xff]  ;;  %v443_v39 = vld [vmem:[%s994_s18 + $0x58] sm:$0xff] }
  0x1a   : > { %469 = vst.msk [vmem:[%s1019_s21 + $0x20] sm:$0xff] %vm464_vm0, %v452_v38  ;;  %v456_v52 = vadd.f32 %v440_v36, %v424_v46  ;;  %v453_v55 = vadd.f32 %v437_v43, %v421_v54  ;;  %v409_v56 = vmul.f32 0.1, %v377_v44  ;;  %v380_v58 = vadd.f32 %v986_v3, %v360_v45  ;;  %v439_v36 = vld [vmem:[%s994_s18 + $0x38] sm:$0xff]  ;;  %v446_v45 = vld [vmem:[%s994_s18 + $0x70] sm:$0xff] }
  0x1b   : > { %v358_v61 = vmul.f32 %v973_v2, %v338_v50  ;;  %v361_v62 = vmul.f32 %v973_v2, %v341_v51  ;;  %467 = vst.msk [vmem:[%s1019_s21 + $0x10] sm:$0xff] %vm464_vm0, %v1043_v53  ;;  %v403_v7 = vmul.f32 0.1, %v371_v59  ;;  %v374_v9 = vadd.f32 %v986_v3, %v354_v60  ;;  %v447_v48 = vld [vmem:[%s994_s18 + $0x78] sm:$0xff] }
  0x1c   : > { %473 = vst.msk [vmem:[%s1019_s21 + $0x40] sm:$0xff] %vm464_vm0, %v456_v52  ;;  %879 = vmatmul.msk.f32.vlgmr.msra.gmra.mxu2 %vm464_vm0, %v456_v52  ;;  %v425_v1 = vsel %vm393_vm7, %v377_v44, %v409_v56  ;;  %vm396_vm8 = vcmp.gt.f32.partialorder %v380_v58, 0.0  ;;  %v412_v4 = vmul.f32 0.1, %v380_v58  ;;  %v355_v14 = vmul.f32 %v973_v2, %v335_v63 }
  0x1d   : > { %470 = vst.msk [vmem:[%s1019_s21 + $0x28] sm:$0xff] %vm464_vm0, %v453_v55  ;;  %v457_v6 = vadd.f32 %v441_v57, %v425_v1  ;;  %v378_v10 = vadd.f32 %v986_v3, %v358_v61  ;;  %v381_v13 = vadd.f32 %v986_v3, %v361_v62  ;;  %v359_v15 = vmul.f32 %v973_v2, %v339_v0 }
  0x1e   : > { %v428_v11 = vsel %vm396_vm8, %v380_v58, %v412_v4  ;;  %v419_v17 = vsel %vm387_vm9, %v371_v59, %v403_v7  ;;  %vm390_vm10 = vcmp.gt.f32.partialorder %v374_v9, 0.0  ;;  %v406_v18 = vmul.f32 0.1, %v374_v9 }
  0x1f   : > { %474 = vst.msk [vmem:[%s1019_s21 + $0x48] sm:$0xff] %vm464_vm0, %v457_v6  ;;  %v460_v16 = vadd.f32 %v444_v5, %v428_v11  ;;  %v451_v21 = vadd.f32 %v435_v8, %v419_v17  ;;  %vm394_vm11 = vcmp.gt.f32.partialorder %v378_v10, 0.0  ;;  %v410_v22 = vmul.f32 0.1, %v378_v10 }
  0x20   : > { %872 = vmatmul.msk.f32.gmra.mxu0 %vm464_vm0, %v449_v34  ;;  %vm397_vm12 = vcmp.gt.f32.partialorder %v381_v13, 0.0  ;;  %v422_v24 = vsel %vm390_vm10, %v374_v9, %v406_v18  ;;  %v413_v25 = vmul.f32 0.1, %v381_v13  ;;  %v375_v27 = vadd.f32 %v986_v3, %v355_v14 }
  0x21   : > { %876 = vmatmul.msk.f32.gmra.mxu1 %vm464_vm0, %v453_v55  ;;  %477 = vst.msk [vmem:[%s1019_s21 + $0x60] sm:$0xff] %vm464_vm0, %v460_v16  ;;  %883 = vmatmul.msk.f32.vlgmr.msra.gmra.mxu3 %vm464_vm0, %v460_v16  ;;  %v379_v28 = vadd.f32 %v986_v3, %v359_v15  ;;  %v454_v29 = vadd.f32 %v438_v12, %v422_v24  ;;  %vm596_vm2 = vcmask 64512   ;;  %vm722_vm3 = vcmask 58368  }
  0x22   : > { %468 = vst.msk [vmem:[%s1019_s21 + $0x18] sm:$0xff] %vm464_vm0, %v451_v21  ;;  %v426_v30 = vsel %vm394_vm11, %v378_v10, %v410_v22  ;;  %v362_v31 = vmul.f32 %v973_v2, %v342_v19  ;;  %v363_v32 = vmul.f32 %v973_v2, %v343_v20  ;;  %v429_v34 = vsel %vm397_vm12, %v381_v13, %v413_v25 }
  0x23   : > { %v458_v33 = vadd.f32 %v442_v23, %v426_v30  ;;  %vm391_vm13 = vcmp.gt.f32.partialorder %v375_v27, 0.0  ;;  %v407_v35 = vmul.f32 0.1, %v375_v27  ;;  %471 = vst.msk [vmem:[%s1019_s21 + $0x30] sm:$0xff] %vm464_vm0, %v454_v29  ;;  %v461_v37 = vadd.f32 %v445_v26, %v429_v34 }
  0x24   : > { %880 = vmatmul.msk.f32.gmra.mxu2 %vm464_vm0, %v457_v6  ;;  %vm395_vm14 = vcmp.gt.f32.partialorder %v379_v28, 0.0  ;;  %v411_v38 = vmul.f32 0.1, %v379_v28  ;;  %v382_v40 = vadd.f32 %v986_v3, %v362_v31  ;;  %v383_v41 = vadd.f32 %v986_v3, %v363_v32 }
  0x25   : > { %475 = vst.msk [vmem:[%s1019_s21 + $0x50] sm:$0xff] %vm464_vm0, %v458_v33  ;;  %v423_v2 = vsel %vm391_vm13, %v375_v27, %v407_v35 }
  0x26   : > { %478 = vst.msk [vmem:[%s1019_s21 + $0x68] sm:$0xff] %vm464_vm0, %v461_v37  ;;  %v455_v42 = vadd.f32 %v439_v36, %v423_v2  ;;  %v427_v43 = vsel %vm395_vm14, %v379_v28, %v411_v38  ;;  %vm398_vm15 = vcmp.gt.f32.partialorder %v382_v40, 0.0  ;;  %v414_v44 = vmul.f32 0.1, %v382_v40 }
  0x27   : > { %v459_v46 = vadd.f32 %v443_v39, %v427_v43  ;;  %vm399_vm1 = vcmp.gt.f32.partialorder %v383_v41, 0.0  ;;  %v415_v47 = vmul.f32 0.1, %v383_v41 }
  0x28   : > { %873 = vmatmul.msk.f32.gmra.mxu0 %vm464_vm0, %v1043_v53  ;;  %472 = vst.msk [vmem:[%s1019_s21 + $0x38] sm:$0xff] %vm464_vm0, %v455_v42  ;;  %v430_v3 = vsel %vm398_vm15, %v382_v40, %v414_v44 }
  0x29   : > { %877 = vmatmul.msk.f32.gmra.mxu1 %vm464_vm0, %v454_v29  ;;  %884 = vmatmul.msk.f32.gmra.mxu3 %vm464_vm0, %v461_v37  ;;  %476 = vst.msk [vmem:[%s1019_s21 + $0x58] sm:$0xff] %vm464_vm0, %v459_v46  ;;  %v462_v49 = vadd.f32 %v446_v45, %v430_v3  ;;  %v431_v50 = vsel %vm399_vm1, %v383_v41, %v415_v47 }
  0x2a   : > { %v463_v51 = vadd.f32 %v447_v48, %v431_v50 }
  0x2b   : > { %479 = vst.msk [vmem:[%s1019_s21 + $0x70] sm:$0xff] %vm464_vm0, %v462_v49 }
  0x2c   : > { %881 = vmatmul.msk.f32.gmra.mxu2 %vm464_vm0, %v458_v33  ;;  %480 = vst.msk [vmem:[%s1019_s21 + $0x78] sm:$0xff] %vm464_vm0, %v463_v51 }
  0x30   : > { %874 = vmatmul.msk.f32.gmra.mxu0 %vm464_vm0, %v451_v21 }
  0x31   : > { %878 = vmatmul.msk.f32.gmra.mxu1 %vm464_vm0, %v455_v42  ;;  %885 = vmatmul.msk.f32.gmra.mxu3 %vm464_vm0, %v462_v49 }
  0x34   : > { %882 = vmatmul.msk.f32.gmra.mxu2 %vm464_vm0, %v459_v46 }
  0x39   : > { %886 = vmatmul.msk.f32.gmra.mxu3 %vm464_vm0, %v463_v51  ;;  %vm720_vm0 = vcmask 1040384  }
  0x95   : > { %v1124_v52 = vpop.f32.mrf.mxu0 }
  0x96   : > { %597 = vst.msk [vmem:[%s1122_s26] sm:$0xff] %vm596_vm2, %v1124_v52  ;;  %v1129_v53 = vpop.f32.mrf.mxu1  ;;  %v613_v62 = vsel %vm596_vm2, %v1124_v52, 0.0 }
  0x97   : > { %601 = vst.msk [vmem:[%s1122_s26 + $0x20] sm:$0xff] %vm596_vm2, %v1129_v53  ;;  %v620_v10 = vsel %vm596_vm2, %v1129_v53, 0.0 }
  0x9d   : > { %v1134_v54 = vpop.f32.mrf.mxu0 }
  0x9e   : > { %598 = vst.msk [vmem:[%s1122_s26 + $0x8] sm:$0xff] %vm596_vm2, %v1134_v54  ;;  %v1139_v55 = vpop.f32.mrf.mxu1  ;;  %v614_v61 = vsel %vm596_vm2, %v1134_v54, 0.0 }
  0x9f   : > { %602 = vst.msk [vmem:[%s1122_s26 + $0x28] sm:$0xff] %vm596_vm2, %v1139_v55  ;;  %v1144_v56 = vpop.f32.mrf.mxu2  ;;  %v615_v0 = vadd.f32 %v614_v61, %v613_v62  ;;  %v622_v12 = vsel %vm596_vm2, %v1139_v55, 0.0 }
  0xa0   : > { %605 = vst.msk [vmem:[%s1122_s26 + $0x40] sm:$0xff] %vm596_vm2, %v1144_v56  ;;  %v628_v20 = vsel %vm596_vm2, %v1144_v56, 0.0 }
  0xa4   : > { %v1149_v58 = vpop.f32.mrf.mxu3 }
  0xa5   : > { %v554_v57 = vpop.f32.mrf.mxu0  ;;  %609 = vst.msk [vmem:[%s1122_s26 + $0x60] sm:$0xff] %vm596_vm2, %v1149_v58  ;;  %v636_v29 = vsel %vm596_vm2, %v1149_v58, 0.0 }
  0xa6   : > { %599 = vst.msk [vmem:[%s1122_s26 + $0x10] sm:$0xff] %vm596_vm2, %v554_v57  ;;  %v1153_v59 = vpop.f32.mrf.mxu1  ;;  %v616_v63 = vsel %vm596_vm2, %v554_v57, 0.0 }
  0xa7   : > { %603 = vst.msk [vmem:[%s1122_s26 + $0x30] sm:$0xff] %vm596_vm2, %v1153_v59  ;;  %v1158_v60 = vpop.f32.mrf.mxu2  ;;  %v617_v1 = vadd.f32 %v616_v63, %v615_v0  ;;  %v624_v14 = vsel %vm596_vm2, %v1153_v59, 0.0 }
  0xa8   : > { %606 = vst.msk [vmem:[%s1122_s26 + $0x48] sm:$0xff] %vm596_vm2, %v1158_v60  ;;  %v630_v22 = vsel %vm596_vm2, %v1158_v60, 0.0 }
  0xac   : > { %v1171_v5 = vpop.f32.mrf.mxu3 }
  0xad   : > { %v557_v4 = vpop.f32.mrf.mxu0  ;;  %610 = vst.msk [vmem:[%s1122_s26 + $0x68] sm:$0xff] %vm596_vm2, %v1171_v5  ;;  %v638_v31 = vsel %vm596_vm2, %v1171_v5, 0.0 }
  0xae   : > { %600 = vst.msk [vmem:[%s1122_s26 + $0x18] sm:$0xff] %vm596_vm2, %v557_v4  ;;  %v618_v6 = vsel %vm596_vm2, %v557_v4, 0.0  ;;  %v569_v7 = vpop.f32.mrf.mxu1 }
  0xaf   : > { %v619_v8 = vadd.f32 %v618_v6, %v617_v1  ;;  %604 = vst.msk [vmem:[%s1122_s26 + $0x38] sm:$0xff] %vm596_vm2, %v569_v7  ;;  %v1178_v9 = vpop.f32.mrf.mxu2  ;;  %v626_v15 = vsel %vm596_vm2, %v569_v7, 0.0 }
  0xb0   : > { %607 = vst.msk [vmem:[%s1122_s26 + $0x50] sm:$0xff] %vm596_vm2, %v1178_v9  ;;  %v632_v24 = vsel %vm596_vm2, %v1178_v9, 0.0 }
  0xb1   : > { %v621_v11 = vadd.f32 %v620_v10, %v619_v8 }
  0xb3   : > { %v623_v13 = vadd.f32 %v622_v12, %v621_v11 }
  0xb4   : > { %v1193_v17 = vpop.f32.mrf.mxu3 }
  0xb5   : > { %v625_v16 = vadd.f32 %v624_v14, %v623_v13  ;;  %611 = vst.msk [vmem:[%s1122_s26 + $0x70] sm:$0xff] %vm596_vm2, %v1193_v17  ;;  %v640_v33 = vsel %vm596_vm2, %v1193_v17, 0.0 }
  0xb7   : > { %v627_v18 = vadd.f32 %v626_v15, %v625_v16  ;;  %v581_v19 = vpop.f32.mrf.mxu2 }
  0xb8   : > { %608 = vst.msk [vmem:[%s1122_s26 + $0x58] sm:$0xff] %vm596_vm2, %v581_v19  ;;  %v634_v25 = vsel %vm596_vm2, %v581_v19, 0.0 }
  0xb9   : > { %v629_v21 = vadd.f32 %v628_v20, %v627_v18 }
  0xbb   : > { %v631_v23 = vadd.f32 %v630_v22, %v629_v21 }
  0xbc   : > { %v1207_v27 = vpop.f32.mrf.mxu3 }
  0xbd   : > { %v633_v26 = vadd.f32 %v632_v24, %v631_v23  ;;  %612 = vst.msk [vmem:[%s1122_s26 + $0x78] sm:$0xff] %vm596_vm2, %v1207_v27  ;;  %v642_v34 = vsel %vm596_vm2, %v1207_v27, 0.0 }
  0xbf   : > { %v635_v28 = vadd.f32 %v634_v25, %v633_v26 }
  0xc1   : > { %v637_v30 = vadd.f32 %v636_v29, %v635_v28 }
  0xc3   : > { %v639_v32 = vadd.f32 %v638_v31, %v637_v30 }
  0xc5   : > { %v641_v35 = vadd.f32 %v640_v33, %v639_v32 }
  0xc7   : > { %v643_v36 = vadd.f32 %v642_v34, %v641_v35 }
  0xc9   : > { %v644_v37 = vrot.slane %v643_v36, 4 }
  0xcb   : > { %v645_v38 = vadd.f32 %v644_v37, %v643_v36 }
  0xcd   : > { %v646_v39 = vrot.slane %v645_v38, 2 }
  0xcf   : > { %v647_v40 = vadd.f32 %v646_v39, %v645_v38 }
  0xd1   : > { %v648_v2 = vrot.slane %v647_v40, 1 }
  0xd3   : > { %v1220_v41 = vadd.f32 %v648_v2, %v647_v40 }
  0xd5   : > { %v650_v42 = vmul.f32 0.0078125, %v1220_v41 }
  0xd7   : > { %v651_v43 = vsub.f32 %v1124_v52, %v650_v42  ;;  %v652_v44 = vsub.f32 %v1134_v54, %v650_v42  ;;  %v653_v45 = vsub.f32 %v554_v57, %v650_v42  ;;  %v654_v46 = vsub.f32 %v557_v4, %v650_v42 }
  0xd8   : > { %v655_v3 = vsub.f32 %v1129_v53, %v650_v42  ;;  %v656_v50 = vsub.f32 %v1139_v55, %v650_v42  ;;  %v657_v0 = vsub.f32 %v1153_v59, %v650_v42  ;;  %v658_v1 = vsub.f32 %v569_v7, %v650_v42 }
  0xd9   : > { %v667_v47 = vmul.f32 %v651_v43, %v651_v43  ;;  %v668_v48 = vmul.f32 %v652_v44, %v652_v44  ;;  %v669_v49 = vmul.f32 %v653_v45, %v653_v45  ;;  %v670_v51 = vmul.f32 %v654_v46, %v654_v46 }
  0xda   : > { %v671_v52 = vmul.f32 %v655_v3, %v655_v3  ;;  %v672_v4 = vmul.f32 %v656_v50, %v656_v50  ;;  %v659_v8 = vsub.f32 %v1144_v56, %v650_v42  ;;  %v673_v55 = vmul.f32 %v657_v0, %v657_v0 }
  0xdb   : > { %v683_v61 = vsel %vm596_vm2, %v667_v47, 0.0  ;;  %v684_v62 = vsel %vm596_vm2, %v668_v48, 0.0  ;;  %v686_v54 = vsel %vm596_vm2, %v669_v49, 0.0  ;;  %v688_v6 = vsel %vm596_vm2, %v670_v51, 0.0 }
  0xdc   : > { %v685_v63 = vadd.f32 %v684_v62, %v683_v61  ;;  %v690_v10 = vsel %vm596_vm2, %v671_v52, 0.0  ;;  %v660_v12 = vsub.f32 %v1158_v60, %v650_v42  ;;  %v674_v13 = vmul.f32 %v658_v1, %v658_v1 }
  0xdd   : > { %v692_v59 = vsel %vm596_vm2, %v672_v4, 0.0  ;;  %v661_v15 = vsub.f32 %v1178_v9, %v650_v42  ;;  %v675_v16 = vmul.f32 %v659_v8, %v659_v8  ;;  %v694_v7 = vsel %vm596_vm2, %v673_v55, 0.0 }
  0xde   : > { %v687_v57 = vadd.f32 %v686_v54, %v685_v63  ;;  %v662_v20 = vsub.f32 %v581_v19, %v650_v42  ;;  %v676_v21 = vmul.f32 %v660_v12, %v660_v12  ;;  %v696_v56 = vsel %vm596_vm2, %v674_v13, 0.0 }
  0xdf   : > { %v663_v23 = vsub.f32 %v1149_v58, %v650_v42  ;;  %v677_v24 = vmul.f32 %v661_v15, %v661_v15  ;;  %v698_v60 = vsel %vm596_vm2, %v675_v16, 0.0  ;;  %v664_v26 = vsub.f32 %v1171_v5, %v650_v42 }
  0xe0   : > { %v689_v53 = vadd.f32 %v688_v6, %v687_v57  ;;  %v678_v28 = vmul.f32 %v662_v20, %v662_v20  ;;  %v700_v9 = vsel %vm596_vm2, %v676_v21, 0.0  ;;  %v665_v30 = vsub.f32 %v1193_v17, %v650_v42 }
  0xe1   : > { %v679_v31 = vmul.f32 %v663_v23, %v663_v23  ;;  %v702_v19 = vsel %vm596_vm2, %v677_v24, 0.0  ;;  %v666_v33 = vsub.f32 %v1207_v27, %v650_v42  ;;  %v680_v58 = vmul.f32 %v664_v26, %v664_v26 }
  0xe2   : > { %v691_v11 = vadd.f32 %v690_v10, %v689_v53  ;;  %v704_v34 = vsel %vm596_vm2, %v678_v28, 0.0  ;;  %v681_v36 = vmul.f32 %v665_v30, %v665_v30 }
  0xe3   : > { %v706_v5 = vsel %vm596_vm2, %v679_v31, 0.0  ;;  %v682_v38 = vmul.f32 %v666_v33, %v666_v33  ;;  %v708_v39 = vsel %vm596_vm2, %v680_v58, 0.0 }
  0xe4   : > { %v693_v14 = vadd.f32 %v692_v59, %v691_v11  ;;  %v710_v40 = vsel %vm596_vm2, %v681_v36, 0.0 }
  0xe5   : > { %v712_v43 = vsel %vm596_vm2, %v682_v38, 0.0 }
  0xe6   : > { %v695_v18 = vadd.f32 %v694_v7, %v693_v14 }
  0xe8   : > { %v697_v22 = vadd.f32 %v696_v56, %v695_v18 }
  0xea   : > { %v699_v25 = vadd.f32 %v698_v60, %v697_v22 }
  0xec   : > { %v701_v29 = vadd.f32 %v700_v9, %v699_v25 }
  0xee   : > { %v703_v32 = vadd.f32 %v702_v19, %v701_v29 }
  0xf0   : > { %v705_v35 = vadd.f32 %v704_v34, %v703_v32 }
  0xf2   : > { %v707_v37 = vadd.f32 %v706_v5, %v705_v35 }
  0xf4   : > { %v709_v17 = vadd.f32 %v708_v39, %v707_v37 }
  0xf6   : > { %v711_v2 = vadd.f32 %v710_v40, %v709_v17 }
  0xf8   : > { %v713_v44 = vadd.f32 %v712_v43, %v711_v2 }
  0xfa   : > { %v714_v27 = vrot.slane %v713_v44, 4 }
  0xfc   : > { %v715_v42 = vadd.f32 %v714_v27, %v713_v44 }
  0xfe   : > { %v716_v45 = vrot.slane %v715_v42, 2 }
 0x100   : > { %v717_v46 = vadd.f32 %v716_v45, %v715_v42 }
 0x102   : > { %v718_v47 = vrot.slane %v717_v46, 1 }
 0x104   : > { %v719_v48 = vadd.f32 %v718_v47, %v717_v46 }
 0x106   : > { %v721_v3 = vsel %vm720_vm0, %v1220_v41, %v719_v48 }
 0x107   : > { %723 = vst.msk [vmem:[%s327_s30] sm:$0x3] %vm722_vm3, %v721_v3 }
 0x108 PF: > { %s18_s24 = sadd.s32 1, %s911_s24  }
 0x109   : > { %p15_p5 = scmp.ge.s32.totalorder %s18_s24, 6  }
 0x10b   :  { %17 = sbr.rel (!%p15_p5) target bundleno = 1 (0x1), region = 97 }

// kernel: residual_block_forward.6
= control target key start
LH: loop header
LB: loop body
LE: loop exit
PB: predicated region body
PF: predicated region fallthrough
CT: control target
= control target key end

     0   :  { %s1656_s24 = smov 0   ;;  %s1658_s25 = smov 0   ;;  %s2105_s0 = inlined_call_operand.vmem [shape: f32[2,16,16,8], index: 0, kind: input, shape index: {}, may-alias: {0,1,2}]   ;;  %s2106_s1 = inlined_call_operand.vmem [shape: f32[2,16,16,8], index: 1, kind: input, shape index: {}, may-alias: {0,1,2}]   ;;  %s2107_s2 = inlined_call_operand.vmem [shape: f32[2,16,16,8], index: 2, kind: input, shape index: {}, may-alias: {0,1,2}]   ;;  %s2108_s3 = inlined_call_operand.vmem [shape: f32[72,16], index: 3, kind: input, shape index: {}]   ;;  %s2109_s4 = inlined_call_operand.vmem [shape: f32[1,8], index: 4, kind: input, shape index: {}]   ;;  %s2110_s5 = inlined_call_operand.vmem [shape: f32[1,8], index: 5, kind: input, shape index: {}]   ;;  %s2111_s6 = inlined_call_operand.vmem [shape: f32[2,16,16,16], index: 6, kind: output, shape index: {0}]   ;;  %s2112_s7 = inlined_call_operand.vmem [shape: f32[2,4,2,16], index: 7, kind: output, shape index: {1}]  }
   0x1   :  { %s1660_s26 = smov 0   ;;  %s1662_s27 = smov 0  }
   0x2   :  { %s1664_s28 = smov 0  }
   0x3 LB: > { %s33_s29 = sadd.s32 1, %s1597_s26  ;;  %s37_s30 = sadd.s32 1, %s1601_s27  ;;  %s1605_s28 = sphi %s1664_s28, %s18_s28   ;;  %s1601_s27 = sphi %s1662_s27, %s2121_s27   ;;  %s1597_s26 = sphi %s1660_s26, %s2120_s26   ;;  %s1593_s25 = sphi %s1658_s25, %s2119_s25   ;;  %s1589_s24 = sphi %s1656_s24, %s2118_s24  }
   0x4   : > { %p35_p0 = scmp.ge.s32.totalorder %s33_s29, 4  ;;  %p1441_p1 = scmp.ge.s32.totalorder %s1605_s28, 1 }
   0x5   : > { %p348_p2 = scmp.lt.s32.totalorder %s1605_s28, 9 }
   0x6   : > { %s2123_s29 = smov (%p35_p0, %s33_s29), 0  ;;  %s2125_s30 = smov (!%p35_p0, %s37_s30), %s1601_s27 }
   0x7   : > { %p349_p3 = pnand %p1441_p1, %p348_p2  ;;  %p39_p4 = scmp.ge.s32.totalorder %s2125_s30, 2 }
   0x8   : > { %s1689_s8 = sshll.u32 (!%p349_p3), %s1589_s24, 2  ;;  %p435_p5 = scmp.lt.s32.totalorder (!%p349_p3), %s1593_s25, 1 }
   0x9   : > { %s2127_s30 = smov (%p39_p4, %s2125_s30), 0  ;;  %352 = sbr.rel (%p349_p3) target bundleno = 511 (0x1ff), region = 44 }
   0xa   : > { %p437_p6 = scmp.lt.s32.totalorder (!%p349_p3), %s1689_s8, 15  ;;  %s1447_s16 = sadd.s32 (!%p349_p3), 4294967295, %s1689_s8 }
   0xb   : > { %p447_p7 = scmp.gt.s32.totalorder (!%p349_p3), %s1447_s16, 0  ;;  %p1448_p8 = scmp.lt.s32.totalorder (!%p349_p3), %s1447_s16, 15 }
   0xc   : > { %p623_p9 = scmp.gt.s32.totalorder (!%p349_p3), %s1589_s24, 0  ;;  %s1611_s13 = smov (!%p349_p3), 32  }
   0xd   : > { %s1486_s14 = sadd.s32 (!%p349_p3), 4, %s1689_s8  ;;  %s1612_s17 = smov (!%p349_p3), 40  }
   0xe   : > { %s2129_s25 = smov (!%p435_p5, %s1593_s25), 1  ;;  %vm512_vm0 = vcmask 57344   ;;  %v1607_v0 = vmov 0.0   ;;  %v1707_v1 = vld [vmem:[%s2109_s4] ss:$0 sm:$0xff]  ;;  %vm582_vm1 = vcmask 64512  }
   0xf   : > { %s438_s9 = scalar_select %p437_p6, %s1689_s8, 15  ;;  %514 = vst.msk [vmem:[#allocation2 + $0x18] sm:$0x1] %vm512_vm0, %v1607_v0  ;;  %v1723_v2 = vld [vmem:[%s2110_s5] ss:$0 sm:$0xff] }
  0x10   : > { %s1697_s10 = sshll.u32 %s2129_s25, 5  ;;  %513 = vst.msk [vmem:[#allocation2] sm:$0x1] %vm512_vm0, %v1607_v0  ;;  %v1756_v25 = vld [vmem:[%s2109_s4] ss:$0 sm:$0xff]  ;;  %p1814_p10 = scmp.lt.s32.totalorder %s1486_s14, 15 }
  0x11   : > { %s1443_s11 = sshll.u32 %s438_s9, 1  ;;  %515 = vst.msk [vmem:[#allocation2 + $0x30] sm:$0x1] %vm512_vm0, %v1607_v0  ;;  %v1767_v29 = vld [vmem:[%s2110_s5] ss:$0 sm:$0xff]  ;;  %s1613_s8 = smov 48  }
  0x12   : > { %s1702_s12 = sadd.s32 %s1697_s10, %s1443_s11  ;;  %516 = vst.msk [vmem:[#allocation2 + $0x48] sm:$0x1] %vm512_vm0, %v1607_v0  ;;  %s2133_s14 = smov (!%p1814_p10, %s1486_s14), 15 }
  0x13   : > { %s1445_s15 = sshll.u32 %s1702_s12, 3  ;;  %517 = vst.msk [vmem:[#allocation2 + $0x60] sm:$0x1] %vm512_vm0, %v1607_v0  ;;  %s2135_s14 = smov (!%p1814_p10, %s2133_s14), 15 }
  0x14   : > { %s1718_s19 = scalar_lea.vmem %s2105_s0, %s1445_s15  ;;  %518 = vst.msk [vmem:[#allocation2 + $0x78] sm:$0x1] %vm512_vm0, %v1607_v0  ;;  %s1460_s18 = sshll.u32 %s2135_s14, 1 }
  0x15   : > { %v527_v3 = vld [vmem:[%s1718_s19 + $0x10] sm:$0xff]  ;;  %v525_v4 = vld [vmem:[%s1718_s19] sm:$0xff]  ;;  %519 = vst.msk [vmem:[#allocation2 + $0x11] sm:$0x1] %vm512_vm0, %v1607_v0  ;;  %v526_v5 = vld [vmem:[%s1718_s19 + $0x8] sm:$0xff]  ;;  %s448_s22 = scalar_select %p447_p7, %s1447_s16, 0 }
  0x16   : > { %v539_v6 = vmul.f32 %v1707_v1, %v527_v3  ;;  %v537_v7 = vmul.f32 %v1707_v1, %v525_v4  ;;  %520 = vst.msk [vmem:[#allocation2 + $0x29] sm:$0x1] %vm512_vm0, %v1607_v0  ;;  %v538_v8 = vmul.f32 %v1707_v1, %v526_v5  ;;  %v529_v9 = vld [vmem:[%s1718_s19 + $0x20] sm:$0xff]  ;;  %v528_v10 = vld [vmem:[%s1718_s19 + $0x18] sm:$0xff]  ;;  %s1747_s23 = scalar_select %p623_p9, 1, 0 }
  0x17   : > { %521 = vst.msk [vmem:[#allocation2 + $0x41] sm:$0x1] %vm512_vm0, %v1607_v0  ;;  %v541_v11 = vmul.f32 %v1707_v1, %v529_v9  ;;  %v540_v12 = vmul.f32 %v1707_v1, %v528_v10  ;;  %s2131_s22 = smov (!%p1448_p8, %s448_s22), 15  ;;  %v530_v28 = vld [vmem:[%s1718_s19 + $0x28] sm:$0xff]  ;;  %v531_v48 = vld [vmem:[%s1718_s19 + $0x30] sm:$0xff]  ;;  %p499_p11 = scmp.lt.s32.totalorder %s1589_s24, 3 }
  0x18   : > { %v551_v13 = vadd.f32 %v1723_v2, %v539_v6  ;;  %v549_v14 = vadd.f32 %v1723_v2, %v537_v7  ;;  %522 = vst.msk [vmem:[#allocation2 + $0x59] sm:$0x1] %vm512_vm0, %v1607_v0  ;;  %v550_v15 = vadd.f32 %v1723_v2, %v538_v8  ;;  %s1453_s9 = sshll.u32 %s2131_s22, 1  ;;  %v542_v31 = vmul.f32 %v1707_v1, %v530_v28  ;;  %s1467_s12 = sshll.u32 %s2129_s25, 2 }
  0x19   : > { %523 = vst.msk [vmem:[#allocation2 + $0x71] sm:$0x1] %vm512_vm0, %v1607_v0  ;;  %v553_v16 = vadd.f32 %v1723_v2, %v541_v11  ;;  %v552_v17 = vadd.f32 %v1723_v2, %v540_v12  ;;  %s455_s11 = sadd.s32 %s1453_s9, %s1697_s10  ;;  %v625_v35 = vstv %s1747_s23  ;;  %s1608_s23 = smov 8   ;;  %v543_v51 = vmul.f32 %v1707_v1, %v531_v48  ;;  %v1064_v48 = vld [vmem:[%s2108_s3 + $0x38] sm:$0xff] }
  0x1a   : > { %vm559_vm2 = vcmp.gt.f32.partialorder %v551_v13, 0.0  ;;  %v567_v18 = vmul.f32 0.1, %v551_v13  ;;  %vm557_vm3 = vcmp.gt.f32.partialorder %v549_v14, 0.0  ;;  %v565_v19 = vmul.f32 0.1, %v549_v14 }
  0x1b   : > { %524 = vst.msk [vmem:[#allocation2 + $0x89] sm:$0x1] %vm512_vm0, %v1607_v0  ;;  %vm558_vm4 = vcmp.gt.f32.partialorder %v550_v15, 0.0  ;;  %v566_v20 = vmul.f32 0.1, %v550_v15  ;;  %vm561_vm5 = vcmp.gt.f32.partialorder %v553_v16, 0.0  ;;  %v554_v37 = vadd.f32 %v1723_v2, %v542_v31 }
  0x1c   : > { %v575_v21 = vsel %vm559_vm2, %v551_v13, %v567_v18  ;;  %v573_v22 = vsel %vm557_vm3, %v549_v14, %v565_v19  ;;  %v569_v23 = vmul.f32 0.1, %v553_v16  ;;  %vm560_vm6 = vcmp.gt.f32.partialorder %v552_v17, 0.0  ;;  %s1455_s16 = sshll.u32 %s455_s11, 3  ;;  %s1609_s9 = smov 16   ;;  %v532_v0 = vld [vmem:[%s1718_s19 + $0x38] sm:$0xff] }
  0x1d   : > { %585 = vst.msk [vmem:[#allocation2 + $0x31] sm:$0xff] %vm582_vm1, %v575_v21  ;;  %v574_v24 = vsel %vm558_vm4, %v550_v15, %v566_v20  ;;  %v568_v26 = vmul.f32 0.1, %v552_v17  ;;  %s457_s20 = scalar_lea.vmem %s2106_s1, %s1455_s16  ;;  %v570_v40 = vmul.f32 0.1, %v554_v37  ;;  %vm1780_vm7 = vcmp.eq.s32.totalorder %v625_v35, 1 }
  0x1e   : > { %583 = vst.msk [vmem:[#allocation2 + $0x19] sm:$0xff] %vm582_vm1, %v573_v22  ;;  %v577_v27 = vsel %vm561_vm5, %v553_v16, %v569_v23  ;;  %v591_v32 = vld [vmem:[%s457_s20] sm:$0xff]  ;;  %v592_v33 = vld [vmem:[%s457_s20 + $0x8] sm:$0xff]  ;;  %vm562_vm8 = vcmp.gt.f32.partialorder %v554_v37, 0.0  ;;  %v555_v56 = vadd.f32 %v1723_v2, %v543_v51  ;;  %s1610_s11 = smov 24   ;;  %v544_v3 = vmul.f32 %v1707_v1, %v532_v0  ;;  %s472_s20 = sadd.s32 %s1460_s18, %s1697_s10 }
  0x1f   : > { %584 = vst.msk [vmem:[#allocation2 + $0x21] sm:$0xff] %vm582_vm1, %v574_v24  ;;  %v576_v30 = vsel %vm560_vm6, %v552_v17, %v568_v26  ;;  %v597_v34 = vmul.f32 %v1756_v25, %v591_v32  ;;  %v598_v36 = vmul.f32 %v1756_v25, %v592_v33  ;;  %v578_v45 = vsel %vm562_vm8, %v554_v37, %v570_v40  ;;  %s1462_s19 = sshll.u32 %s472_s20, 3  ;;  %s1614_s10 = smov 56   ;;  %v1057_v0 = vld [vmem:[%s2108_s3] sm:$0xff] }
  0x20   : > { %587 = vst.msk [vmem:[#allocation2 + $0x49] sm:$0xff] %vm582_vm1, %v577_v27  ;;  %v571_v59 = vmul.f32 0.1, %v555_v56  ;;  %vm563_vm11 = vcmp.gt.f32.partialorder %v555_v56, 0.0  ;;  %v556_v4 = vadd.f32 %v1723_v2, %v544_v3  ;;  %s1842_s14 = scalar_lea.vmem %s2107_s2, %s1462_s19  ;;  %s1615_s18 = smov 64   ;;  %vm696_vm0 = vcmask 130112  }
  0x21   : > { %586 = vst.msk [vmem:[#allocation2 + $0x39] sm:$0xff] %vm582_vm1, %v576_v30  ;;  %v603_v38 = vadd.f32 %v1767_v29, %v597_v34  ;;  %v604_v39 = vadd.f32 %v1767_v29, %v598_v36  ;;  %v611_v2 = vld [vmem:[%s1842_s14] sm:$0xff]  ;;  %s632_s16 = scalar_select %p499_p11, 1, 0  ;;  %v612_v19 = vld [vmem:[%s1842_s14 + $0x8] sm:$0xff]  ;;  %vm745_vm2 = vcmask 195712  }
  0x22   : > { %588 = vst.msk [vmem:[#allocation2 + $0x51] sm:$0xff] %vm582_vm1, %v578_v45  ;;  %v579_v60 = vsel %vm563_vm11, %v555_v56, %v571_v59  ;;  %v572_v5 = vmul.f32 0.1, %v556_v4  ;;  %vm564_vm12 = vcmp.gt.f32.partialorder %v556_v4, 0.0  ;;  %v613_v7 = vmul.f32 %v1756_v25, %v611_v2  ;;  %s2137_s24 = smov (!%p499_p11, %s1589_s24), 3 }
  0x23   : > { %vm605_vm9 = vcmp.gt.f32.partialorder %v603_v38, 0.0  ;;  %v607_v44 = vmul.f32 0.1, %v603_v38  ;;  %vm606_vm10 = vcmp.gt.f32.partialorder %v604_v39, 0.0  ;;  %v608_v46 = vmul.f32 0.1, %v604_v39 }
  0x24   : > { %v1778_v41 = vld [vmem:[#allocation2 + $0x31] sm:$0xff]  ;;  %589 = vst.msk [vmem:[#allocation2 + $0x61] sm:$0xff] %vm582_vm1, %v579_v60  ;;  %v580_v6 = vsel %vm564_vm12, %v556_v4, %v572_v5  ;;  %v615_v8 = vadd.f32 %v1767_v29, %v613_v7  ;;  %v633_v11 = vstv %s632_s16  ;;  %v614_v21 = vmul.f32 %v1756_v25, %v612_v19 }
  0x25   : > { %680 = vrot.lane.b32.xlu1 %v1778_v41, %s1608_s23  ;;  %v658_v43 = vld [vmem:[#allocation2 + $0x19] sm:$0xff]  ;;  %v756_v47 = vld [vmem:[#allocation2 + $0x30] sm:$0xff]  ;;  %v609_v50 = vsel %vm605_vm9, %v603_v38, %v607_v44  ;;  %v610_v53 = vsel %vm606_vm10, %v604_v39, %v608_v46  ;;  %590 = vst.msk [vmem:[#allocation2 + $0x69] sm:$0xff] %vm582_vm1, %v580_v6  ;;  %vm1855_vm14 = vcmp.eq.s32.totalorder %v633_v11, 1  ;;  %vm794_vm3 = vcmask 261312  }
  0x26   : > { %676 = vrot.lane.b32.xlu0 %v658_v43, %s1608_s23  ;;  %v754_v49 = vld [vmem:[#allocation2 + $0x18] sm:$0xff]  ;;  %652 = vst.msk [vmem:[#allocation3 + $0x20] sm:$0xff] %vm582_vm1, %v756_v47  ;;  %v627_v52 = vsel %vm1780_vm7, %v609_v50, 0.0  ;;  %v628_v55 = vsel %vm1780_vm7, %v610_v53, 0.0  ;;  %v619_v9 = vmul.f32 0.1, %v615_v8  ;;  %v616_v22 = vadd.f32 %v1767_v29, %v614_v21 }
  0x27   : > { %650 = vst.msk [vmem:[#allocation3 + $0x10] sm:$0xff] %vm582_vm1, %v754_v49  ;;  %v1802_v57 = vld [vmem:[#allocation2 + $0x48] sm:$0xff]  ;;  %v707_v58 = vld [vmem:[#allocation2 + $0x1a] sm:$0xff]  ;;  %vm617_vm13 = vcmp.gt.f32.partialorder %v615_v8, 0.0  ;;  %vm843_vm4 = vcmask 326912   ;;  %vm892_vm5 = vcmask 392512  }
  0x28   : > { %v1793_v54 = vld [vmem:[#allocation2 + $0x32] sm:$0xff]  ;;  %629 = vst.msk [vmem:[#allocation2 + $0x1] sm:$0xff] %vm582_vm1, %v627_v52  ;;  %v1822_v62 = vld [vmem:[#allocation2 + $0x49] sm:$0xff]  ;;  %v621_v12 = vsel %vm617_vm13, %v615_v8, %v619_v9  ;;  %v755_v20 = vld [vmem:[#allocation2 + $0x20] sm:$0xff]  ;;  %v620_v24 = vmul.f32 0.1, %v616_v22 }
  0x29   : > { %729 = vrot.lane.b32.xlu2 %v1793_v54, %s1609_s9  ;;  %630 = vst.msk [vmem:[#allocation2 + $0x9] sm:$0xff] %vm582_vm1, %v628_v55  ;;  %v711_v1 = vld [vmem:[#allocation2 + $0x4a] sm:$0xff]  ;;  %v635_v14 = vsel %vm1855_vm14, %v621_v12, 0.0  ;;  %v661_v23 = vld [vmem:[#allocation2 + $0x39] sm:$0xff]  ;;  %vm618_vm15 = vcmp.gt.f32.partialorder %v616_v22, 0.0  ;;  %v804_v31 = vld [vmem:[#allocation2 + $0x21] sm:$0xff] }
  0x2a   : > { %654 = vst.msk [vmem:[#allocation3 + $0x30] sm:$0xff] %vm582_vm1, %v1802_v57  ;;  %v1869_v16 = vld [vmem:[#allocation2 + $0x50] sm:$0xff]  ;;  %v622_v27 = vsel %vm618_vm15, %v616_v22, %v620_v24  ;;  %v903_v25 = vld [vmem:[#allocation2 + $0x38] sm:$0xff]  ;;  %v708_v34 = vld [vmem:[#allocation2 + $0x22] sm:$0xff]  ;;  %vm991_vm6 = vcmask 523712   ;;  %vm1040_vm7 = vcmask 589312  }
  0x2b   : > { %v906_v10 = vld [vmem:[#allocation2 + $0x60] sm:$0xff]  ;;  %638 = vst.msk [vmem:[#allocation2 + $0x79] sm:$0xff] %vm582_vm1, %v635_v14  ;;  %v636_v28 = vsel %vm1855_vm14, %v622_v27, 0.0  ;;  %v1908_v37 = vld [vmem:[#allocation2 + $0x51] sm:$0xff]  ;;  %v1062_v53 = vld [vmem:[%s2108_s3 + $0x28] sm:$0xff]  ;;  %vm1066_vm8 = vcmask 588800  }
  0x2c   : > { %655 = vst.msk [vmem:[#allocation3 + $0x38] sm:$0xff] %vm582_vm1, %v1869_v16  ;;  %v809_v17 = vld [vmem:[#allocation2 + $0x61] sm:$0xff]  ;;  %v1920_v42 = vld [vmem:[#allocation2 + $0x52] sm:$0xff]  ;;  %v859_v5 = vld [vmem:[#allocation2 + $0x6a] sm:$0xff]  ;;  %vm1132_vm9 = vcmask 130048   ;;  %vm1200_vm10 = vcmask 1040384  }
  0x2d   : > { %770 = vrot.lane.b32.xlu1 %v754_v49, %s1610_s11  ;;  %651 = vst.msk [vmem:[#allocation3 + $0x18] sm:$0xff] %vm582_vm1, %v755_v20  ;;  %v1004_v26 = vld [vmem:[#allocation2 + $0x62] sm:$0xff]  ;;  %v1891_v29 = vld [vmem:[#allocation2 + $0x3a] sm:$0xff]  ;;  %v1063_v52 = vld [vmem:[%s2108_s3 + $0x30] sm:$0xff]  ;;  %vm1202_vm11 = vcmask 123904  }
  0x2e   : > { %725 = vrot.lane.b32.xlu0 %v707_v58, %s1609_s9  ;;  %639 = vst.msk [vmem:[#allocation2 + $0x81] sm:$0xff] %vm582_vm1, %v636_v28  ;;  %v1065_v46 = vld [vmem:[%s2108_s3 + $0x40] sm:$0xff]  ;;  %v761_v51 = vld [vmem:[#allocation2 + $0x68] sm:$0xff]  ;;  %v1059_v60 = vld [vmem:[%s2108_s3 + $0x10] sm:$0xff] }
  0x2f   : > { %v656_v61 = vld [vmem:[#allocation2 + $0x1] sm:$0xff]  ;;  %653 = vst.msk [vmem:[#allocation3 + $0x28] sm:$0xff] %vm582_vm1, %v903_v25  ;;  %1098 = vmatpush.msra.mxu0 %v1065_v46  ;;  %1488 = vmatpush.msra.mxu2 %v1065_v46 }
  0x30   : > { %v705_v63 = vld [vmem:[#allocation2 + $0x2] sm:$0xff]  ;;  %v706_v18 = vld [vmem:[#allocation2 + $0xa] sm:$0xff]  ;;  %1487 = vmatpush.msra.mxu1 %v1065_v46  ;;  %1489 = vmatpush.msra.mxu3 %v1065_v46 }
  0x31   : > { %819 = vrot.lane.b32.xlu2 %v658_v43, %s1611_s13  ;;  %v657_v15 = vld [vmem:[#allocation2 + $0x9] sm:$0xff]  ;;  %v640_v33 = vld [vmem:[#allocation2] sm:$0xff]  ;;  %1099 = vmatpush.msra.mxu0 %v1064_v48 }
  0x32   : > { %v908_v30 = vld [vmem:[#allocation2 + $0x78] sm:$0xff]  ;;  %648 = vst.msk [vmem:[#allocation3] sm:$0xff] %vm582_vm1, %v640_v33  ;;  %1491 = vmatpush.msra.mxu2 %v1064_v48  ;;  %1490 = vmatpush.msra.mxu1 %v1064_v48  ;;  %v1061_v55 = vld [vmem:[%s2108_s3 + $0x20] sm:$0xff]  ;;  %v641_v56 = vld [vmem:[#allocation2 + $0x8] sm:$0xff] }
  0x33   : > { %v957_v35 = vld [vmem:[#allocation2 + $0x79] sm:$0xff]  ;;  %1492 = vmatpush.msra.mxu3 %v1064_v48  ;;  %1100 = vmatpush.msra.mxu0 %v1063_v52  ;;  %649 = vst.msk [vmem:[#allocation3 + $0x8] sm:$0xff] %vm582_vm1, %v641_v56  ;;  %vm942_vm1 = vcmask 458112  }
  0x34   : > { %1494 = vmatpush.msra.mxu2 %v1063_v52  ;;  %1493 = vmatpush.msra.mxu1 %v1063_v52 }
  0x35   : > { %778 = vrot.lane.b32.xlu1 %v1802_v57, %s1610_s11  ;;  %v1006_v38 = vld [vmem:[#allocation2 + $0x7a] sm:$0xff]  ;;  %1495 = vmatpush.msra.mxu3 %v1063_v52  ;;  %v1007_v12 = vld [vmem:[#allocation2 + $0x82] sm:$0xff] }
  0x36   : > { %672 = vrot.lane.b32.xlu0 %v656_v61, %s1608_s23  ;;  %1101 = vmatpush.msra.mxu0 %v1062_v53  ;;  %v1058_v61 = vld [vmem:[%s2108_s3 + $0x8] sm:$0xff]  ;;  %v909_v7 = vld [vmem:[#allocation2 + $0x80] sm:$0xff] }
  0x37   : > { %1497 = vmatpush.msra.mxu2 %v1062_v53  ;;  %1496 = vmatpush.msra.mxu1 %v1062_v53  ;;  %v958_v9 = vld [vmem:[#allocation2 + $0x81] sm:$0xff] }
  0x38   : > { %1102 = vmatpush.msra.mxu0 %v1061_v55  ;;  %1498 = vmatpush.msra.mxu3 %v1062_v53 }
  0x39   : > { %868 = vrot.lane.b32.xlu2 %v707_v58, %s1612_s17  ;;  %1500 = vmatpush.msra.mxu2 %v1061_v55 }
  0x3a   : > { %1499 = vmatpush.msra.mxu1 %v1061_v55  ;;  %1501 = vmatpush.msra.mxu3 %v1061_v55 }
  0x3d   : > { %827 = vrot.lane.b32.xlu1 %v1822_v62, %s1611_s13 }
  0x3e   : > { %721 = vrot.lane.b32.xlu0 %v705_v63, %s1609_s9 }
  0x41   : > { %918 = vrot.lane.b32.xlu2 %v756_v47, %s1613_s8 }
  0x45   : > { %774 = vrot.lane.b32.xlu1 %v756_v47, %s1610_s11 }
  0x46   : > { %684 = vrot.lane.b32.xlu0 %v1822_v62, %s1608_s23 }
  0x49   : > { %876 = vrot.lane.b32.xlu2 %v711_v1, %s1612_s17 }
  0x4d   : > { %733 = vrot.lane.b32.xlu1 %v711_v1, %s1609_s9 }
  0x4e   : > { %967 = vrot.lane.b32.xlu0 %v1778_v41, %s1614_s10 }
  0x51   : > { %823 = vrot.lane.b32.xlu2 %v1778_v41, %s1611_s13 }
  0x55   : > { %1016 = vrot.lane.b32.xlu1 %v1793_v54, %s1615_s18 }
  0x56   : > { %926 = vrot.lane.b32.xlu0 %v906_v10, %s1613_s8 }
  0x59   : > { %674 = vrot.lane.b32.xlu2 %v657_v15, %s1608_s23 }
  0x5d   : > { %872 = vrot.lane.b32.xlu1 %v1793_v54, %s1612_s17 }
  0x5e   : > { %782 = vrot.lane.b32.xlu0 %v906_v10, %s1610_s11 }
  0x61   : > { %975 = vrot.lane.b32.xlu2 %v809_v17, %s1614_s10 }
  0x65   : > { %831 = vrot.lane.b32.xlu1 %v809_v17, %s1611_s13 }
  0x66   : > { %723 = vrot.lane.b32.xlu0 %v706_v18, %s1609_s9 }
  0x69   : > { %922 = vrot.lane.b32.xlu2 %v1802_v57, %s1613_s8  ;;  %v1060_v57 = vld [vmem:[%s2108_s3 + $0x18] sm:$0xff] }
  0x6a   : > { %1103 = vmatpush.msra.mxu0 %v1060_v57  ;;  %1503 = vmatpush.msra.mxu2 %v1060_v57 }
  0x6b   : > { %1502 = vmatpush.msra.mxu1 %v1060_v57  ;;  %1504 = vmatpush.msra.mxu3 %v1060_v57 }
  0x6c   : > { %1104 = vmatpush.msra.mxu0 %v1059_v60  ;;  %1506 = vmatpush.msra.mxu2 %v1059_v60 }
  0x6d   : > { %682 = vrot.lane.b32.xlu1 %v661_v23, %s1608_s23  ;;  %1505 = vmatpush.msra.mxu1 %v1059_v60 }
  0x6e   : > { %1024 = vrot.lane.b32.xlu0 %v1004_v26, %s1615_s18  ;;  %1105 = vmatpush.msra.mxu0 %v1058_v61 }
  0x6f   : > { %1509 = vmatpush.msra.mxu2 %v1058_v61  ;;  %1508 = vmatpush.msra.mxu1 %v1058_v61 }
  0x70   : > { %1106 = vmatpush.msra.mxu0 %v1057_v0  ;;  %1507 = vmatpush.msra.mxu3 %v1059_v60 }
  0x71   : > { %772 = vrot.lane.b32.xlu2 %v755_v20, %s1610_s11  ;;  %1512 = vmatpush.msra.mxu2 %v1057_v0 }
  0x72   : > { %1511 = vmatpush.msra.mxu1 %v1057_v0  ;;  %1510 = vmatpush.msra.mxu3 %v1058_v61 }
  0x74   : > { %1513 = vmatpush.msra.mxu3 %v1057_v0 }
  0x75   : > { %971 = vrot.lane.b32.xlu1 %v1822_v62, %s1614_s10  ;;  %v810_v62 = vld [vmem:[#allocation2 + $0x69] sm:$0xff] }
  0x76   : > { %880 = vrot.lane.b32.xlu0 %v1004_v26, %s1612_s17 }
  0x79   : > { %731 = vrot.lane.b32.xlu2 %v1891_v29, %s1609_s9 }
  0x7d   : > { %930 = vrot.lane.b32.xlu1 %v908_v30, %s1613_s8 }
  0x7e   : > { %821 = vrot.lane.b32.xlu0 %v804_v31, %s1611_s13 }
  0x81   : > { %1020 = vrot.lane.b32.xlu2 %v711_v1, %s1615_s18 }
  0x83   : > { %v730_v32 = vpop.permute.xlu2 %729 }
  0x85   : > { %780 = vrot.lane.b32.xlu1 %v1869_v16, %s1610_s11 }
  0x86   : > { %678 = vrot.lane.b32.xlu0 %v804_v31, %s1608_s23 }
  0x89   : > { %870 = vrot.lane.b32.xlu2 %v708_v34, %s1612_s17 }
  0x8b   : > { %v1904_v36 = vpop.permute.xlu2 %819 }
  0x8d   : > { %727 = vrot.lane.b32.xlu1 %v708_v34, %s1609_s9 }
  0x8e   : > { %979 = vrot.lane.b32.xlu0 %v957_v35, %s1614_s10 }
  0x91   : > { %829 = vrot.lane.b32.xlu2 %v1908_v37, %s1611_s13 }
  0x93   : > { %v1912_v39 = vpop.permute.xlu2 %868 }
  0x95   : > { %1028 = vrot.lane.b32.xlu1 %v1006_v38, %s1615_s18 }
  0x96   : > { %920 = vrot.lane.b32.xlu0 %v903_v25, %s1613_s8 }
  0x97   : > { %v681_v40 = vpop.permute.xlu1 %680 }
  0x98   : > { %701 = vst.msk [vmem:[#allocation3 + $0x20] sm:$0xff] %vm696_vm0, %v681_v40  ;;  %v677_v41 = vpop.permute.xlu0 %676 }
  0x99   : > { %699 = vst.msk [vmem:[#allocation3 + $0x10] sm:$0xff] %vm696_vm0, %v677_v41  ;;  %686 = vrot.lane.b32.xlu2 %v1908_v37, %s1608_s23 }
  0x9a   : > { %750 = vst.msk [vmem:[#allocation3 + $0x20] sm:$0xff] %vm745_vm2, %v730_v32 }
  0x9b   : > { %v1923_v43 = vpop.permute.xlu2 %918 }
  0x9d   : > { %878 = vrot.lane.b32.xlu1 %v1920_v42, %s1612_s17 }
  0x9e   : > { %776 = vrot.lane.b32.xlu0 %v903_v25, %s1610_s11 }
  0x9f   : > { %v771_v44 = vpop.permute.xlu1 %770 }
  0xa0   : > { %v726_v45 = vpop.permute.xlu0 %725 }
  0xa1   : > { %748 = vst.msk [vmem:[#allocation3 + $0x10] sm:$0xff] %vm745_vm2, %v726_v45  ;;  %969 = vrot.lane.b32.xlu2 %v661_v23, %s1614_s10 }
  0xa3   : > { %v1933_v47 = vpop.permute.xlu2 %876 }
  0xa5   : > { %825 = vrot.lane.b32.xlu1 %v661_v23, %s1611_s13 }
  0xa6   : > { %735 = vrot.lane.b32.xlu0 %v1920_v42, %s1609_s9 }
  0xa7   : > { %v779_v49 = vpop.permute.xlu1 %778 }
  0xa8   : > { %799 = vst.msk [vmem:[#allocation3 + $0x20] sm:$0xff] %vm794_vm3, %v779_v49  ;;  %v673_v50 = vpop.permute.xlu0 %672 }
  0xa9   : > { %697 = vst.msk [vmem:[#allocation3] sm:$0xff] %vm696_vm0, %v673_v50  ;;  %928 = vrot.lane.b32.xlu2 %v761_v51, %s1613_s8 }
  0xab   : > { %v824_v54 = vpop.permute.xlu2 %823 }
  0xad   : > { %784 = vrot.lane.b32.xlu1 %v761_v51, %s1610_s11 }
  0xae   : > { %1018 = vrot.lane.b32.xlu0 %v1891_v29, %s1615_s18 }
  0xaf   : > { %v828_v58 = vpop.permute.xlu1 %827 }
  0xb0   : > { %848 = vst.msk [vmem:[#allocation3 + $0x20] sm:$0xff] %vm843_vm4, %v828_v58  ;;  %v722_v59 = vpop.permute.xlu0 %721 }
  0xb1   : > { %746 = vst.msk [vmem:[#allocation3] sm:$0xff] %vm745_vm2, %v722_v59  ;;  %874 = vrot.lane.b32.xlu2 %v1891_v29, %s1612_s17 }
  0xb2   : > { %795 = vst.msk [vmem:[#allocation3] sm:$0xff] %vm794_vm3, %v771_v44 }
  0xb3   : > { %844 = vst.msk [vmem:[#allocation3] sm:$0xff] %vm843_vm4, %v1904_v36  ;;  %v675_v63 = vpop.permute.xlu2 %674 }
  0xb4   : > { %893 = vst.msk [vmem:[#allocation3] sm:$0xff] %vm892_vm5, %v1912_v39 }
  0xb5   : > { %833 = vrot.lane.b32.xlu1 %v810_v62, %s1611_s13  ;;  %943 = vst.msk [vmem:[#allocation3] sm:$0xff] %vm942_vm1, %v1923_v43 }
  0xb6   : > { %977 = vrot.lane.b32.xlu0 %v810_v62, %s1614_s10  ;;  %897 = vst.msk [vmem:[#allocation3 + $0x20] sm:$0xff] %vm892_vm5, %v1933_v47 }
  0xb7   : > { %v775_v3 = vpop.permute.xlu1 %774  ;;  %698 = vst.msk [vmem:[#allocation3 + $0x8] sm:$0xff] %vm696_vm0, %v675_v63 }
  0xb8   : > { %797 = vst.msk [vmem:[#allocation3 + $0x10] sm:$0xff] %vm794_vm3, %v775_v3  ;;  %v685_v4 = vpop.permute.xlu0 %684 }
  0xb9   : > { %703 = vst.msk [vmem:[#allocation3 + $0x30] sm:$0xff] %vm696_vm0, %v685_v4  ;;  %924 = vrot.lane.b32.xlu2 %v1869_v16, %s1613_s8 }
  0xba   : > { %846 = vst.msk [vmem:[#allocation3 + $0x10] sm:$0xff] %vm843_vm4, %v824_v54 }
  0xbb   : > { %v976_v6 = vpop.permute.xlu2 %975 }
  0xbd   : > { %882 = vrot.lane.b32.xlu1 %v859_v5, %s1612_s17 }
  0xbe   : > { %1026 = vrot.lane.b32.xlu0 %v859_v5, %s1615_s18 }
  0xbf   : > { %v734_v1 = vpop.permute.xlu1 %733 }
  0xc0   : > { %752 = vst.msk [vmem:[#allocation3 + $0x30] sm:$0xff] %vm745_vm2, %v734_v1  ;;  %v968_v2 = vpop.permute.xlu0 %967 }
  0xc1   : > { %992 = vst.msk [vmem:[#allocation3] sm:$0xff] %vm991_vm6, %v968_v2  ;;  %973 = vrot.lane.b32.xlu2 %v1908_v37, %s1614_s10 }
  0xc3   : > { %v923_v8 = vpop.permute.xlu2 %922 }
  0xc5   : > { %1022 = vrot.lane.b32.xlu1 %v1920_v42, %s1615_s18 }
  0xc6   : > { %932 = vrot.lane.b32.xlu0 %v909_v7, %s1613_s8  ;;  %s495_s8 = scalar_lea.vmem %s2111_s6, %s1445_s15  ;;  %s505_s15 = sadd.s32 %s1467_s12, %s2137_s24 }
  0xc7   : > { %v1017_v10 = vpop.permute.xlu1 %1016 }
  0xc8   : > { %1041 = vst.msk [vmem:[#allocation3] sm:$0xff] %vm1040_vm7, %v1017_v10  ;;  %v927_v11 = vpop.permute.xlu0 %926 }
  0xc9   : > { %947 = vst.msk [vmem:[#allocation3 + $0x20] sm:$0xff] %vm942_vm1, %v927_v11  ;;  %981 = vrot.lane.b32.xlu2 %v958_v9, %s1614_s10  ;;  %s1468_s10 = sshll.u32 %s505_s15, 1 }
  0xca   : > { %996 = vst.msk [vmem:[#allocation3 + $0x20] sm:$0xff] %vm991_vm6, %v976_v6  ;;  %s507_s23 = scalar_lea.vmem %s2112_s7, %s1468_s10 }
  0xcb   : > { %v773_v13 = vpop.permute.xlu2 %772 }
  0xce   : > { %1030 = vrot.lane.b32.xlu0 %v1007_v12, %s1615_s18 }
  0xcf   : > { %v873_v14 = vpop.permute.xlu1 %872  ;;  %v1049_v15 = vld [vmem:[#allocation3] sm:$0xff] }
  0xd0   : > { %895 = vst.msk [vmem:[#allocation3 + $0x10] sm:$0xff] %vm892_vm5, %v873_v14  ;;  %v783_v16 = vpop.permute.xlu0 %782  ;;  %1469 = vmatmul.msk.f32.vlgmr.msra.gmra.mxu0 %vm1066_vm8, %v1049_v15 }
  0xd1   : > { %801 = vst.msk [vmem:[#allocation3 + $0x30] sm:$0xff] %vm794_vm3, %v783_v16 }
  0xd2   : > { %945 = vst.msk [vmem:[#allocation3 + $0x10] sm:$0xff] %vm942_vm1, %v923_v8 }
  0xd3   : > { %v732_v17 = vpop.permute.xlu2 %731 }
  0xd7   : > { %v832_v18 = vpop.permute.xlu1 %831 }
  0xd8   : > { %850 = vst.msk [vmem:[#allocation3 + $0x30] sm:$0xff] %vm843_vm4, %v832_v18  ;;  %v724_v19 = vpop.permute.xlu0 %723 }
  0xd9   : > { %747 = vst.msk [vmem:[#allocation3 + $0x8] sm:$0xff] %vm745_vm2, %v724_v19 }
  0xda   : > { %796 = vst.msk [vmem:[#allocation3 + $0x8] sm:$0xff] %vm794_vm3, %v773_v13 }
  0xdb   : > { %v1021_v20 = vpop.permute.xlu2 %1020 }
  0xdf   : > { %v683_v21 = vpop.permute.xlu1 %682 }
  0xe0   : > { %702 = vst.msk [vmem:[#allocation3 + $0x28] sm:$0xff] %vm696_vm0, %v683_v21  ;;  %v1025_v22 = vpop.permute.xlu0 %1024 }
  0xe1   : > { %1045 = vst.msk [vmem:[#allocation3 + $0x20] sm:$0xff] %vm1040_vm7, %v1025_v22 }
  0xe2   : > { %751 = vst.msk [vmem:[#allocation3 + $0x28] sm:$0xff] %vm745_vm2, %v732_v17 }
  0xe3   : > { %v871_v23 = vpop.permute.xlu2 %870 }
  0xe7   : > { %v972_v24 = vpop.permute.xlu1 %971 }
  0xe8   : > { %994 = vst.msk [vmem:[#allocation3 + $0x10] sm:$0xff] %vm991_vm6, %v972_v24  ;;  %v881_v26 = vpop.permute.xlu0 %880  ;;  %v1053_v27 = vld [vmem:[#allocation3 + $0x20] sm:$0xff] }
  0xe9   : > { %899 = vst.msk [vmem:[#allocation3 + $0x30] sm:$0xff] %vm892_vm5, %v881_v26  ;;  %1473 = vmatmul.msk.f32.vlgmr.msra.gmra.mxu2 %vm1066_vm8, %v1053_v27 }
  0xea   : > { %1043 = vst.msk [vmem:[#allocation3 + $0x10] sm:$0xff] %vm1040_vm7, %v1021_v20 }
  0xeb   : > { %v830_v28 = vpop.permute.xlu2 %829 }
  0xef   : > { %v931_v25 = vpop.permute.xlu1 %930 }
  0xf0   : > { %949 = vst.msk [vmem:[#allocation3 + $0x30] sm:$0xff] %vm942_vm1, %v931_v25  ;;  %v822_v29 = vpop.permute.xlu0 %821 }
  0xf1   : > { %845 = vst.msk [vmem:[#allocation3 + $0x8] sm:$0xff] %vm843_vm4, %v822_v29  ;;  %v1051_v30 = vld [vmem:[#allocation3 + $0x10] sm:$0xff] }
  0xf2   : > { %894 = vst.msk [vmem:[#allocation3 + $0x8] sm:$0xff] %vm892_vm5, %v871_v23  ;;  %1471 = vmatmul.msk.f32.vlgmr.msra.gmra.mxu1 %vm1066_vm8, %v1051_v30 }
  0xf3   : > { %v687_v31 = vpop.permute.xlu2 %686 }
  0xf4   : > { %704 = vst.msk [vmem:[#allocation3 + $0x38] sm:$0xff] %vm696_vm0, %v687_v31 }
  0xf7   : > { %v781_v32 = vpop.permute.xlu1 %780 }
  0xf8   : > { %800 = vst.msk [vmem:[#allocation3 + $0x28] sm:$0xff] %vm794_vm3, %v781_v32  ;;  %v679_v33 = vpop.permute.xlu0 %678 }
  0xf9   : > { %700 = vst.msk [vmem:[#allocation3 + $0x18] sm:$0xff] %vm696_vm0, %v679_v33 }
  0xfa   : > { %849 = vst.msk [vmem:[#allocation3 + $0x28] sm:$0xff] %vm843_vm4, %v830_v28 }
  0xfb   : > { %v970_v34 = vpop.permute.xlu2 %969 }
  0xff   : > { %v728_v35 = vpop.permute.xlu1 %727 }
 0x100   : > { %749 = vst.msk [vmem:[#allocation3 + $0x18] sm:$0xff] %vm745_vm2, %v728_v35  ;;  %v980_v36 = vpop.permute.xlu0 %979 }
 0x101   : > { %998 = vst.msk [vmem:[#allocation3 + $0x30] sm:$0xff] %vm991_vm6, %v980_v36 }
 0x103   : > { %v929_v37 = vpop.permute.xlu2 %928 }
 0x107   : > { %v1029_v38 = vpop.permute.xlu1 %1028 }
 0x108   : > { %1047 = vst.msk [vmem:[#allocation3 + $0x30] sm:$0xff] %vm1040_vm7, %v1029_v38  ;;  %v921_v39 = vpop.permute.xlu0 %920 }
 0x109   : > { %944 = vst.msk [vmem:[#allocation3 + $0x8] sm:$0xff] %vm942_vm1, %v921_v39 }
 0x10a   : > { %993 = vst.msk [vmem:[#allocation3 + $0x8] sm:$0xff] %vm991_vm6, %v970_v34 }
 0x10b   : > { %v875_v40 = vpop.permute.xlu2 %874 }
 0x10f   : > { %v879_v41 = vpop.permute.xlu1 %878  ;;  %v1055_v42 = vld [vmem:[#allocation3 + $0x30] sm:$0xff] }
 0x110   : > { %898 = vst.msk [vmem:[#allocation3 + $0x28] sm:$0xff] %vm892_vm5, %v879_v41  ;;  %v777_v43 = vpop.permute.xlu0 %776  ;;  %1475 = vmatmul.msk.f32.vlgmr.msra.gmra.mxu3 %vm1066_vm8, %v1055_v42 }
 0x111   : > { %798 = vst.msk [vmem:[#allocation3 + $0x18] sm:$0xff] %vm794_vm3, %v777_v43 }
 0x112   : > { %948 = vst.msk [vmem:[#allocation3 + $0x28] sm:$0xff] %vm942_vm1, %v929_v37 }
 0x113   : > { %v925_v44 = vpop.permute.xlu2 %924 }
 0x117   : > { %v826_v45 = vpop.permute.xlu1 %825 }
 0x118   : > { %847 = vst.msk [vmem:[#allocation3 + $0x18] sm:$0xff] %vm843_vm4, %v826_v45  ;;  %v736_v46 = vpop.permute.xlu0 %735 }
 0x119   : > { %753 = vst.msk [vmem:[#allocation3 + $0x38] sm:$0xff] %vm745_vm2, %v736_v46 }
 0x11a   : > { %896 = vst.msk [vmem:[#allocation3 + $0x18] sm:$0xff] %vm892_vm5, %v875_v40 }
 0x11b   : > { %946 = vst.msk [vmem:[#allocation3 + $0x18] sm:$0xff] %vm942_vm1, %v925_v44  ;;  %v974_v47 = vpop.permute.xlu2 %973 }
 0x11c   : > { %995 = vst.msk [vmem:[#allocation3 + $0x18] sm:$0xff] %vm991_vm6, %v974_v47 }
 0x11f   : > { %v785_v48 = vpop.permute.xlu1 %784 }
 0x120   : > { %802 = vst.msk [vmem:[#allocation3 + $0x38] sm:$0xff] %vm794_vm3, %v785_v48  ;;  %v1019_v49 = vpop.permute.xlu0 %1018 }
 0x121   : > { %1042 = vst.msk [vmem:[#allocation3 + $0x8] sm:$0xff] %vm1040_vm7, %v1019_v49 }
 0x123   : > { %v982_v56 = vpop.permute.xlu2 %981 }
 0x127   : > { %v834_v50 = vpop.permute.xlu1 %833 }
 0x128   : > { %851 = vst.msk [vmem:[#allocation3 + $0x38] sm:$0xff] %vm843_vm4, %v834_v50  ;;  %v978_v51 = vpop.permute.xlu0 %977  ;;  %v1050_v52 = vld [vmem:[#allocation3 + $0x8] sm:$0xff] }
 0x129   : > { %997 = vst.msk [vmem:[#allocation3 + $0x28] sm:$0xff] %vm991_vm6, %v978_v51  ;;  %1470 = vmatmul.msk.f32.gmra.mxu0 %vm1066_vm8, %v1050_v52 }
 0x12f   : > { %v883_v53 = vpop.permute.xlu1 %882 }
 0x130   : > { %900 = vst.msk [vmem:[#allocation3 + $0x38] sm:$0xff] %vm892_vm5, %v883_v53  ;;  %v1027_v54 = vpop.permute.xlu0 %1026 }
 0x131   : > { %1046 = vst.msk [vmem:[#allocation3 + $0x28] sm:$0xff] %vm1040_vm7, %v1027_v54 }
 0x137   : > { %v1023_v55 = vpop.permute.xlu1 %1022 }
 0x138   : > { %1044 = vst.msk [vmem:[#allocation3 + $0x18] sm:$0xff] %vm1040_vm7, %v1023_v55  ;;  %v933_v57 = vpop.permute.xlu0 %932  ;;  %v1054_v58 = vld [vmem:[#allocation3 + $0x28] sm:$0xff] }
 0x139   : > { %950 = vst.msk [vmem:[#allocation3 + $0x38] sm:$0xff] %vm942_vm1, %v933_v57  ;;  %1474 = vmatmul.msk.f32.gmra.mxu2 %vm1066_vm8, %v1054_v58 }
 0x13a   : > { %999 = vst.msk [vmem:[#allocation3 + $0x38] sm:$0xff] %vm991_vm6, %v982_v56 }
 0x13f   : > { %v1052_v59 = vld [vmem:[#allocation3 + $0x18] sm:$0xff] }
 0x140   : > { %v1031_v60 = vpop.permute.xlu0 %1030  ;;  %1472 = vmatmul.msk.f32.gmra.mxu1 %vm1066_vm8, %v1052_v59 }
 0x141   : > { %1048 = vst.msk [vmem:[#allocation3 + $0x38] sm:$0xff] %vm1040_vm7, %v1031_v60 }
 0x148   : > { %v1056_v61 = vld [vmem:[#allocation3 + $0x38] sm:$0xff] }
 0x149   : > { %1476 = vmatmul.msk.f32.gmra.mxu3 %vm1066_vm8, %v1056_v61 }
 0x14d   : > { %v1108_v62 = vpop.f32.mrf.mxu0 }
 0x14e   : > { %1133 = vst.msk [vmem:[%s495_s8] sm:$0xff] %vm1132_vm9, %v1108_v62  ;;  %v1141_v6 = vsel %vm1132_vm9, %v1108_v62, 0.0 }
 0x16c   : > { %v1120_v63 = vpop.f32.mrf.mxu2 }
 0x16d   : > { %1137 = vst.msk [vmem:[%s495_s8 + $0x20] sm:$0xff] %vm1132_vm9, %v1120_v63  ;;  %v1148_v12 = vsel %vm1132_vm9, %v1120_v63, 0.0 }
 0x16f   : > { %v1114_v0 = vpop.f32.mrf.mxu1 }
 0x170   : > { %1135 = vst.msk [vmem:[%s495_s8 + $0x10] sm:$0xff] %vm1132_vm9, %v1114_v0  ;;  %v1144_v7 = vsel %vm1132_vm9, %v1114_v0, 0.0 }
 0x193   : > { %v1126_v3 = vpop.f32.mrf.mxu3 }
 0x194   : > { %1139 = vst.msk [vmem:[%s495_s8 + $0x30] sm:$0xff] %vm1132_vm9, %v1126_v3  ;;  %v1152_v16 = vsel %vm1132_vm9, %v1126_v3, 0.0 }
 0x1a6   : > { %v1111_v4 = vpop.f32.mrf.mxu0 }
 0x1a7   : > { %1134 = vst.msk [vmem:[%s495_s8 + $0x8] sm:$0xff] %vm1132_vm9, %v1111_v4  ;;  %v1142_v5 = vsel %vm1132_vm9, %v1111_v4, 0.0 }
 0x1a8   : > { %v1143_v1 = vadd.f32 %v1142_v5, %v1141_v6 }
 0x1aa   : > { %v1145_v9 = vadd.f32 %v1144_v7, %v1143_v1 }
 0x1bc   : > { %v1123_v2 = vpop.f32.mrf.mxu2 }
 0x1bd   : > { %1138 = vst.msk [vmem:[%s495_s8 + $0x28] sm:$0xff] %vm1132_vm9, %v1123_v2  ;;  %v1117_v8 = vpop.f32.mrf.mxu1  ;;  %v1150_v14 = vsel %vm1132_vm9, %v1123_v2, 0.0 }
 0x1be   : > { %1136 = vst.msk [vmem:[%s495_s8 + $0x18] sm:$0xff] %vm1132_vm9, %v1117_v8  ;;  %v1146_v10 = vsel %vm1132_vm9, %v1117_v8, 0.0 }
 0x1bf   : > { %v1147_v11 = vadd.f32 %v1146_v10, %v1145_v9 }
 0x1c1   : > { %v1149_v13 = vadd.f32 %v1148_v12, %v1147_v11 }
 0x1c3   : > { %v1151_v15 = vadd.f32 %v1150_v14, %v1149_v13 }
 0x1c5   : > { %v1153_v18 = vadd.f32 %v1152_v16, %v1151_v15 }
 0x1cc   : > { %v1129_v17 = vpop.f32.mrf.mxu3 }
 0x1cd   : > { %1140 = vst.msk [vmem:[%s495_s8 + $0x38] sm:$0xff] %vm1132_vm9, %v1129_v17  ;;  %v1154_v19 = vsel %vm1132_vm9, %v1129_v17, 0.0 }
 0x1ce   : > { %v1155_v20 = vadd.f32 %v1154_v19, %v1153_v18 }
 0x1d0   : > { %v1156_v21 = vrot.slane %v1155_v20, 4 }
 0x1d2   : > { %v1157_v22 = vadd.f32 %v1156_v21, %v1155_v20 }
 0x1d4   : > { %v1158_v23 = vrot.slane %v1157_v22, 2 }
 0x1d6   : > { %v1159_v24 = vadd.f32 %v1158_v23, %v1157_v22 }
 0x1d8   : > { %v1160_v26 = vrot.slane %v1159_v24, 1 }
 0x1da   : > { %v1161_v27 = vadd.f32 %v1160_v26, %v1159_v24 }
 0x1dc   : > { %v1162_v28 = vmul.f32 0.015625, %v1161_v27 }
 0x1de   : > { %v1163_v25 = vsub.f32 %v1108_v62, %v1162_v28  ;;  %v1164_v29 = vsub.f32 %v1111_v4, %v1162_v28  ;;  %v1165_v30 = vsub.f32 %v1114_v0, %v1162_v28  ;;  %v1166_v31 = vsub.f32 %v1117_v8, %v1162_v28 }
 0x1df   : > { %v1167_v32 = vsub.f32 %v1120_v63, %v1162_v28  ;;  %v1168_v36 = vsub.f32 %v1123_v2, %v1162_v28  ;;  %v1169_v41 = vsub.f32 %v1126_v3, %v1162_v28  ;;  %v1170_v45 = vsub.f32 %v1129_v17, %v1162_v28 }
 0x1e0   : > { %v1171_v33 = vmul.f32 %v1163_v25, %v1163_v25  ;;  %v1172_v34 = vmul.f32 %v1164_v29, %v1164_v29  ;;  %v1173_v35 = vmul.f32 %v1165_v30, %v1165_v30  ;;  %v1174_v37 = vmul.f32 %v1166_v31, %v1166_v31 }
 0x1e1   : > { %v1175_v42 = vmul.f32 %v1167_v32, %v1167_v32  ;;  %v1176_v46 = vmul.f32 %v1168_v36, %v1168_v36  ;;  %v1177_v49 = vmul.f32 %v1169_v41, %v1169_v41  ;;  %v1178_v52 = vmul.f32 %v1170_v45, %v1170_v45 }
 0x1e2   : > { %v1179_v38 = vsel %vm1132_vm9, %v1171_v33, 0.0  ;;  %v1180_v39 = vsel %vm1132_vm9, %v1172_v34, 0.0  ;;  %v1182_v43 = vsel %vm1132_vm9, %v1173_v35, 0.0  ;;  %v1184_v47 = vsel %vm1132_vm9, %v1174_v37, 0.0 }
 0x1e3   : > { %v1181_v40 = vadd.f32 %v1180_v39, %v1179_v38  ;;  %v1186_v50 = vsel %vm1132_vm9, %v1175_v42, 0.0  ;;  %v1188_v53 = vsel %vm1132_vm9, %v1176_v46, 0.0  ;;  %v1190_v55 = vsel %vm1132_vm9, %v1177_v49, 0.0 }
 0x1e4   : > { %v1192_v57 = vsel %vm1132_vm9, %v1178_v52, 0.0 }
 0x1e5   : > { %v1183_v44 = vadd.f32 %v1182_v43, %v1181_v40 }
 0x1e7   : > { %v1185_v48 = vadd.f32 %v1184_v47, %v1183_v44 }
 0x1e9   : > { %v1187_v51 = vadd.f32 %v1186_v50, %v1185_v48 }
 0x1eb   : > { %v1189_v54 = vadd.f32 %v1188_v53, %v1187_v51 }
 0x1ed   : > { %v1191_v56 = vadd.f32 %v1190_v55, %v1189_v54 }
 0x1ef   : > { %v1193_v58 = vadd.f32 %v1192_v57, %v1191_v56 }
 0x1f1   : > { %v1194_v59 = vrot.slane %v1193_v58, 4 }
 0x1f3   : > { %v1195_v60 = vadd.f32 %v1194_v59, %v1193_v58 }
 0x1f5   : > { %v1196_v61 = vrot.slane %v1195_v60, 2 }
 0x1f7   : > { %v1197_v62 = vadd.f32 %v1196_v61, %v1195_v60 }
 0x1f9   : > { %v1198_v63 = vrot.slane %v1197_v62, 1 }
 0x1fb   : > { %v1199_v0 = vadd.f32 %v1198_v63, %v1197_v62 }
 0x1fd   : > { %v1201_v3 = vsel %vm1200_vm10, %v1161_v27, %v1199_v0 }
 0x1fe   : > { %1203 = vst.msk [vmem:[%s507_s23] sm:$0x3] %vm1202_vm11, %v1201_v3 }
 0x1ff PF: > { %s18_s28 = sadd.s32 1, %s1605_s28   ;;  %s2118_s24 = smov %s1597_s26 }
 0x200   : > { %p15_p12 = scmp.ge.s32.totalorder %s18_s28, 10   ;;  %s2119_s25 = smov %s1601_s27 }
 0x201   : > { %s2120_s26 = smov %s2123_s29  ;;  %s2121_s27 = smov %s2127_s30 }
 0x202   :  { %17 = sbr.rel (!%p15_p12) target bundleno = 3 (0x3), region = 102 }

</bundles_post_ra>
